<compile_context>
chip_gen: v5e
topology: v5e:2x2
jax: 0.10.0
libtpu: 0.0.40
codegen_flags: <defaults>
</compile_context>

<pallas_src>
import functools
import math

import jax
import jax.numpy as jnp
from jax import lax
from jax.experimental import pallas as pl
from jax.experimental.pallas import tpu as pltpu

MXU_DTYPE = jnp.bfloat16   # MXU operand dtype; set to jnp.float32 for exact f32 math
LN_EPS = 1e-5


# --------------------------------------------------------------------------
# Kernel 1: fused MHA (QKV proj + attention + out proj) + residual + LayerNorm
# --------------------------------------------------------------------------

def _mha_ln_kernel(x_ref, kv_ref, mask_ref,
                   wq_ref, wkv_ref, wo_ref,
                   bq_ref, bkv_ref, bo_ref,
                   g_ref, beta_ref, o_ref,
                   *, num_heads, scale, eps):
    x = x_ref[0]                                   # (T, E) f32, query + residual
    kv = kv_ref[0]                                 # (S, E) f32 (self: x, cross: memory)
    E = x.shape[-1]
    dh = E // num_heads

    # Projections: one (T,E)x(E,E) matmul for Q and one (S,E)x(E,2E) for K/V.
    q = jnp.dot(x.astype(wq_ref.dtype), wq_ref[...],
                preferred_element_type=jnp.float32) + bq_ref[...]
    kvp = jnp.dot(kv.astype(wkv_ref.dtype), wkv_ref[...],
                  preferred_element_type=jnp.float32) + bkv_ref[...]
    k = kvp[:, :E]
    v = kvp[:, E:]

    mask = mask_ref[...]                           # (T, S) additive f32 mask
    qb = q.astype(wq_ref.dtype)                    # hoisted casts (out of head loop)
    kb = k.astype(wq_ref.dtype)
    vb = v.astype(wq_ref.dtype)

    heads = []
    for h in range(num_heads):                     # static unroll, H is small
        lo = h * dh
        qs = qb[:, lo:lo + dh]                     # (T, dh)
        ks = kb[:, lo:lo + dh]                     # (S, dh)
        vs = vb[:, lo:lo + dh]                     # (S, dh)
        # scores = q @ k^T without materializing a transpose.
        s = lax.dot_general(qs, ks, (((1,), (1,)), ((), ())),
                            preferred_element_type=jnp.float32)
        s = s * scale + mask                       # (T, S) f32
        # NOTE: a fully -inf masked row would produce NaN (matches PyTorch).
        m = jnp.max(s, axis=-1, keepdims=True)
        p = jnp.exp(s - m)
        denom = jnp.sum(p, axis=-1, keepdims=True)
        p = p * pl.reciprocal(denom, approx=True)  # EUP slot; frees the VPU
        heads.append(jnp.dot(p.astype(vb.dtype), vs,
                             preferred_element_type=jnp.float32))
    attn = jnp.concatenate(heads, axis=-1)         # (T, E) f32

    # Output projection fused in the same kernel.
    o = jnp.dot(attn.astype(wo_ref.dtype), wo_ref[...],
                preferred_element_type=jnp.float32) + bo_ref[...]

    # Residual + LayerNorm epilogue (f32 math).
    z = x + o
    mean = jnp.mean(z, axis=-1, keepdims=True)
    cz = z - mean
    var = jnp.mean(cz * cz, axis=-1, keepdims=True)
    o_ref[0] = (cz * lax.rsqrt(var + eps)) * g_ref[...] + beta_ref[...]


def mha_ln(x, kv, mask, ap, ln_g, ln_b, num_heads):
    """Returns LayerNorm(x + MHA(x, kv, kv)).  x: (B,T,E), kv: (B,S,E)."""
    B, T, E = x.shape
    S = kv.shape[1]
    scale = 1.0 / math.sqrt(E // num_heads)
    kernel = functools.partial(_mha_ln_kernel, num_heads=num_heads,
                               scale=scale, eps=LN_EPS)
    const = lambda b: (0, 0)
    return pl.pallas_call(
        kernel,
        out_shape=jax.ShapeDtypeStruct((B, T, E), jnp.float32),
        grid=(B,),
        in_specs=[
            pl.BlockSpec((1, T, E), lambda b: (b, 0, 0)),   # x (query + residual)
            pl.BlockSpec((1, S, E), lambda b: (b, 0, 0)),   # kv source
            pl.BlockSpec((T, S), const),                    # additive mask
            pl.BlockSpec((E, E), const),                    # Wq (bf16)
            pl.BlockSpec((E, 2 * E), const),                # Wkv stacked (bf16)
            pl.BlockSpec((E, E), const),                    # Wo (bf16)
            pl.BlockSpec((1, E), const),                    # bq
            pl.BlockSpec((1, 2 * E), const),                # bkv
            pl.BlockSpec((1, E), const),                    # bo
            pl.BlockSpec((1, E), const),                    # LN gamma
            pl.BlockSpec((1, E), const),                    # LN beta
        ],
        out_specs=pl.BlockSpec((1, T, E), lambda b: (b, 0, 0)),
        compiler_params=pltpu.CompilerParams(dimension_semantics=("parallel",)),
    )(x, kv, mask, ap['wq'], ap['wkv'], ap['wo'],
      ap['bq'], ap['bkv'], ap['bo'], ln_g, ln_b)


# --------------------------------------------------------------------------
# Kernel 2: fused FFN (linear1 + ReLU + linear2) + residual + LayerNorm
# --------------------------------------------------------------------------

def _ffn_ln_kernel(x_ref, w1_ref, b1_ref, w2_ref, b2_ref, g_ref, beta_ref,
                   o_ref, *, eps):
    x = x_ref[...]                                 # (tm, E) f32
    h = jnp.dot(x.astype(w1_ref.dtype), w1_ref[...],
                preferred_element_type=jnp.float32) + b1_ref[...]
    h = jnp.maximum(h, 0.0)                        # fused ReLU
    ff = jnp.dot(h.astype(w2_ref.dtype), w2_ref[...],
                 preferred_element_type=jnp.float32) + b2_ref[...]
    z = x + ff
    mean = jnp.mean(z, axis=-1, keepdims=True)
    cz = z - mean
    var = jnp.mean(cz * cz, axis=-1, keepdims=True)
    o_ref[...] = (cz * lax.rsqrt(var + eps)) * g_ref[...] + beta_ref[...]


def ffn_ln(x, lp, tm_pref=256):
    """Returns LayerNorm(x + linear2(relu(linear1(x)))).  x: (M, E) flattened tokens."""
    M, E = x.shape
    F = lp['w1'].shape[1]
    tm = M if M <= tm_pref else tm_pref
    const = lambda i: (0, 0)
    return pl.pallas_call(
        functools.partial(_ffn_ln_kernel, eps=LN_EPS),
        out_shape=jax.ShapeDtypeStruct((M, E), jnp.float32),
        grid=(pl.cdiv(M, tm),),
        in_specs=[
            pl.BlockSpec((tm, E), lambda i: (i, 0)),
            pl.BlockSpec((E, F), const),
            pl.BlockSpec((1, F), const),
            pl.BlockSpec((F, E), const),
            pl.BlockSpec((1, E), const),
            pl.BlockSpec((1, E), const),
            pl.BlockSpec((1, E), const),
        ],
        out_specs=pl.BlockSpec((tm, E), lambda i: (i, 0)),
        compiler_params=pltpu.CompilerParams(dimension_semantics=("parallel",)),
    )(x, lp['w1'], lp['b1'], lp['w2'], lp['b2'], lp['ln3_g'], lp['ln3_b'])


# --------------------------------------------------------------------------
# Kernel 3: tiled linear (x @ W + b) with a VMEM f32 accumulator (vocab head)
# --------------------------------------------------------------------------

def _linear_kernel(x_ref, w_ref, b_ref, o_ref, acc_ref):
    @pl.when(pl.program_id(2) == 0)
    def _():
        acc_ref[...] = jnp.zeros_like(acc_ref)
    acc_ref[...] += jnp.dot(x_ref[...].astype(w_ref.dtype), w_ref[...],
                            preferred_element_type=jnp.float32)
    @pl.when(pl.program_id(2) == pl.num_programs(2) - 1)
    def _():
        o_ref[...] = acc_ref[...] + b_ref[...]     # bias hoisted out of the K loop


def linear(x, w, b, *, tm=256, tn=512, tk=512):
    """x: (M, K) f32, w: (K, N) bf16, b: (1, N) f32 -> (M, N) f32."""
    M, K = x.shape
    N = w.shape[1]
    tm = M if M <= tm else tm
    tn = N if N <= tn else tn
    # K tiles must cover K exactly (a padded K tile would corrupt the accumulator).
    tk = K if (K <= tk or K % tk != 0) else tk
    return pl.pallas_call(
        _linear_kernel,
        out_shape=jax.ShapeDtypeStruct((M, N), jnp.float32),
        grid=(pl.cdiv(M, tm), pl.cdiv(N, tn), K // tk),
        in_specs=[pl.BlockSpec((tm, tk), lambda i, j, k: (i, k)),
                  pl.BlockSpec((tk, tn), lambda i, j, k: (k, j)),
                  pl.BlockSpec((1, tn), lambda i, j, k: (0, j))],
        out_specs=pl.BlockSpec((tm, tn), lambda i, j, k: (i, j)),
        scratch_shapes=[pltpu.VMEM((tm, tn), jnp.float32)],
        compiler_params=pltpu.CompilerParams(
            dimension_semantics=("parallel", "parallel", "arbitrary")),
    )(x, w, b)


# ------------------------------ model (glue) -------------------------------

def decoder_block(x, memory_b, lp, num_heads, tgt_mask, mem_mask):
    B, T, E = x.shape
    x = mha_ln(x, x, tgt_mask, lp['self_attn'], lp['ln1_g'], lp['ln1_b'], num_heads)
    x = mha_ln(x, memory_b, mem_mask, lp['cross_attn'], lp['ln2_g'], lp['ln2_b'], num_heads)
    x = ffn_ln(x.reshape(B * T, E), lp).reshape(B, T, E)
    return x


def transformer_decoder_forward(params, tgt_input, memory, *, num_heads,
                                tgt_mask=None, memory_mask=None):
    """tgt_input: (B, T) int ids; memory: (S, B, E) seq-first. Returns (B, T, vocab)."""
    B, T = tgt_input.shape
    E = params['tok_emb'].shape[1]
    # Token + positional embedding lookup stays in XLA (gather); dropout == identity (eval).
    x = params['tok_emb'][tgt_input] + params['pos_emb'][jnp.arange(T)][None, :, :]  # (B,T,E)
    # PyTorch memory is seq-first (S, B, E); transpose ONCE to batch-major.
    memory_b = jnp.transpose(memory, (1, 0, 2))                                       # (B,S,E)
    S = memory_b.shape[1]
    tmask = (jnp.zeros((T, T), jnp.float32) if tgt_mask is None
             else tgt_mask.astype(jnp.float32))
    mmask = (jnp.zeros((T, S), jnp.float32) if memory_mask is None
             else memory_mask.astype(jnp.float32))
    for lp in params['layers']:
        x = decoder_block(x, memory_b, lp, num_heads, tmask, mmask)
    logits = linear(x.reshape(B * T, E), params['fc_w'], params['fc_b'])
    return logits.reshape(B, T, -1)


def generate_square_subsequent_mask(sz):
    return jnp.triu(jnp.full((sz, sz), float('-inf'), jnp.float32), k=1)


# ------------------------- deterministic param init ------------------------
# Weights are stored pre-oriented for `x @ W` and pre-cast to bf16 (MXU operands);
# biases / LayerNorm params / embeddings stay f32.

def _init_mha_params(key, E):
    ks = jax.random.split(key, 6)
    s = 0.02
    return dict(
        wq=(jax.random.normal(ks[0], (E, E), jnp.float32) * s).astype(MXU_DTYPE),
        wkv=(jax.random.normal(ks[1], (E, 2 * E), jnp.float32) * s).astype(MXU_DTYPE),
        wo=(jax.random.normal(ks[2], (E, E), jnp.float32) * s).astype(MXU_DTYPE),
        bq=jax.random.normal(ks[3], (1, E), jnp.float32) * s,
        bkv=jax.random.normal(ks[4], (1, 2 * E), jnp.float32) * s,
        bo=jax.random.normal(ks[5], (1, E), jnp.float32) * s,
    )


def _init_layer_params(key, E, F):
    ks = jax.random.split(key, 6)
    s = 0.02
    return dict(
        self_attn=_init_mha_params(ks[0], E),
        cross_attn=_init_mha_params(ks[1], E),
        w1=(jax.random.normal(ks[2], (E, F), jnp.float32) * s).astype(MXU_DTYPE),
        b1=jax.random.normal(ks[3], (1, F), jnp.float32) * s,
        w2=(jax.random.normal(ks[4], (F, E), jnp.float32) * s).astype(MXU_DTYPE),
        b2=jax.random.normal(ks[5], (1, E), jnp.float32) * s,
        ln1_g=jnp.ones((1, E), jnp.float32), ln1_b=jnp.zeros((1, E), jnp.float32),
        ln2_g=jnp.ones((1, E), jnp.float32), ln2_b=jnp.zeros((1, E), jnp.float32),
        ln3_g=jnp.ones((1, E), jnp.float32), ln3_b=jnp.zeros((1, E), jnp.float32),
    )


def init_params(key, vocab, max_len, E, F, num_layers):
    ks = jax.random.split(key, num_layers + 4)
    s = 0.02
    return dict(
        tok_emb=jax.random.normal(ks[0], (vocab, E), jnp.float32) * s,
        pos_emb=jax.random.normal(ks[1], (max_len, E), jnp.float32) * s,
        layers=[_init_layer_params(ks[2 + i], E, F) for i in range(num_layers)],
        fc_w=(jax.random.normal(ks[-2], (E, vocab), jnp.float32) * s).astype(MXU_DTYPE),
        fc_b=jax.random.normal(ks[-1], (1, vocab), jnp.float32) * s,
    )


# ----------------------------------- main -----------------------------------

if __name__ == "__main__":
    vocab_size, max_len, embed_dim, num_heads, ff_dim, num_layers = 50, 16, 32, 4, 64, 2
    B, T, S = 2, 8, 10

    key = jax.random.PRNGKey(0)
    kp, kt, km = jax.random.split(key, 3)
    params = init_params(kp, vocab_size, max_len, embed_dim, ff_dim, num_layers)

    tgt_input = jax.random.randint(kt, (B, T), 0, vocab_size)             # (B, T) ids
    memory = jax.random.normal(km, (S, B, embed_dim), jnp.float32)         # seq-first memory
    tgt_mask = generate_square_subsequent_mask(T)                          # causal additive mask

    fwd = jax.jit(transformer_decoder_forward, static_argnames=("num_heads",))
    logits = fwd(params, tgt_input, memory, num_heads=num_heads,
                 tgt_mask=tgt_mask, memory_mask=None)
    logits = jax.block_until_ready(logits)

    assert logits.shape == (B, T, vocab_size), logits.shape
    assert bool(jnp.all(jnp.isfinite(logits)))
    print("KERNEL_OK")
</pallas_src>

<mosaic_0001>
module attributes {stable_mosaic.version = 11 : i64} {
  func.func @_mha_ln_kernel(%arg0: i32, %arg1: memref<1x8x32xf32, #tpu.memory_space<vmem>>, %arg2: memref<1x8x32xf32, #tpu.memory_space<vmem>>, %arg3: memref<8x8xf32, #tpu.memory_space<vmem>>, %arg4: memref<32x32xbf16, #tpu.memory_space<vmem>>, %arg5: memref<32x64xbf16, #tpu.memory_space<vmem>>, %arg6: memref<32x32xbf16, #tpu.memory_space<vmem>>, %arg7: memref<1x32xf32, #tpu.memory_space<vmem>>, %arg8: memref<1x64xf32, #tpu.memory_space<vmem>>, %arg9: memref<1x32xf32, #tpu.memory_space<vmem>>, %arg10: memref<1x32xf32, #tpu.memory_space<vmem>>, %arg11: memref<1x32xf32, #tpu.memory_space<vmem>>, %arg12: memref<1x8x32xf32, #tpu.memory_space<vmem>>) attributes {dimension_semantics = [#tpu.dimension_semantics<parallel>], iteration_bounds = array<i64: 2>, scalar_prefetch = 0 : i64, scratch_operands = 0 : i64, tpu.core_type = #tpu.core_type<tc>, window_params = [{transform_indices = @transform_0, window_bounds = array<i64: 1, 8, 32>}, {transform_indices = @transform_1, window_bounds = array<i64: 1, 8, 32>}, {pipeline_mode = #tpu.pipeline_mode<synchronous>, transform_indices = @transform_2, window_bounds = array<i64: 8, 8>}, {pipeline_mode = #tpu.pipeline_mode<synchronous>, transform_indices = @transform_3, window_bounds = array<i64: 32, 32>}, {pipeline_mode = #tpu.pipeline_mode<synchronous>, transform_indices = @transform_4, window_bounds = array<i64: 32, 64>}, {pipeline_mode = #tpu.pipeline_mode<synchronous>, transform_indices = @transform_5, window_bounds = array<i64: 32, 32>}, {pipeline_mode = #tpu.pipeline_mode<synchronous>, transform_indices = @transform_6, window_bounds = array<i64: 1, 32>}, {pipeline_mode = #tpu.pipeline_mode<synchronous>, transform_indices = @transform_7, window_bounds = array<i64: 1, 64>}, {pipeline_mode = #tpu.pipeline_mode<synchronous>, transform_indices = @transform_8, window_bounds = array<i64: 1, 32>}, {pipeline_mode = #tpu.pipeline_mode<synchronous>, transform_indices = @transform_9, window_bounds = array<i64: 1, 32>}, {pipeline_mode = #tpu.pipeline_mode<synchronous>, transform_indices = @transform_10, window_bounds = array<i64: 1, 32>}, {transform_indices = @transform_11, window_bounds = array<i64: 1, 8, 32>}]} {
    %c0 = arith.constant 0 : index
    %c0_0 = arith.constant 0 : index
    %c0_1 = arith.constant 0 : index
    %0 = vector.load %arg1[%c0, %c0_0, %c0_1] : memref<1x8x32xf32, #tpu.memory_space<vmem>>, vector<1x8x32xf32>
    %1 = vector.shape_cast %0 : vector<1x8x32xf32> to vector<8x32xf32>
    %c0_2 = arith.constant 0 : index
    %c0_3 = arith.constant 0 : index
    %c0_4 = arith.constant 0 : index
    %2 = vector.load %arg2[%c0_2, %c0_3, %c0_4] : memref<1x8x32xf32, #tpu.memory_space<vmem>>, vector<1x8x32xf32>
    %3 = vector.shape_cast %2 : vector<1x8x32xf32> to vector<8x32xf32>
    %4 = arith.truncf %1 : vector<8x32xf32> to vector<8x32xbf16>
    %c0_5 = arith.constant 0 : index
    %c0_6 = arith.constant 0 : index
    %5 = vector.load %arg4[%c0_5, %c0_6] : memref<32x32xbf16, #tpu.memory_space<vmem>>, vector<32x32xbf16>
    %cst = arith.constant dense<0.000000e+00> : vector<8x32xf32>
    %6 = tpu.matmul %4, %5, %cst {dimension_numbers = #tpu.dot_dimension_numbers<[1], [0], [0], [1], [0, 0, 1, 1], [], []>} : vector<8x32xbf16>, vector<32x32xbf16>, vector<8x32xf32> -> vector<8x32xf32>
    %c0_7 = arith.constant 0 : index
    %c0_8 = arith.constant 0 : index
    %7 = vector.load %arg7[%c0_7, %c0_8] : memref<1x32xf32, #tpu.memory_space<vmem>>, vector<1x32xf32>
    %8 = vector.broadcast %7 : vector<1x32xf32> to vector<8x32xf32>
    %9 = arith.addf %6, %8 : vector<8x32xf32>
    %10 = arith.truncf %3 : vector<8x32xf32> to vector<8x32xbf16>
    %c0_9 = arith.constant 0 : index
    %c0_10 = arith.constant 0 : index
    %11 = vector.load %arg5[%c0_9, %c0_10] : memref<32x64xbf16, #tpu.memory_space<vmem>>, vector<32x64xbf16>
    %cst_11 = arith.constant dense<0.000000e+00> : vector<8x64xf32>
    %12 = tpu.matmul %10, %11, %cst_11 {dimension_numbers = #tpu.dot_dimension_numbers<[1], [0], [0], [1], [0, 0, 1, 1], [], []>} : vector<8x32xbf16>, vector<32x64xbf16>, vector<8x64xf32> -> vector<8x64xf32>
    %c0_12 = arith.constant 0 : index
    %c0_13 = arith.constant 0 : index
    %13 = vector.load %arg8[%c0_12, %c0_13] : memref<1x64xf32, #tpu.memory_space<vmem>>, vector<1x64xf32>
    %14 = vector.broadcast %13 : vector<1x64xf32> to vector<8x64xf32>
    %15 = arith.addf %12, %14 : vector<8x64xf32>
    %16 = vector.extract_strided_slice %15 {offsets = [0, 0], sizes = [8, 32], strides = [1, 1]} : vector<8x64xf32> to vector<8x32xf32>
    %17 = vector.extract_strided_slice %15 {offsets = [0, 32], sizes = [8, 32], strides = [1, 1]} : vector<8x64xf32> to vector<8x32xf32>
    %c0_14 = arith.constant 0 : index
    %c0_15 = arith.constant 0 : index
    %18 = vector.load %arg3[%c0_14, %c0_15] : memref<8x8xf32, #tpu.memory_space<vmem>>, vector<8x8xf32>
    %19 = arith.truncf %9 : vector<8x32xf32> to vector<8x32xbf16>
    %20 = arith.truncf %16 : vector<8x32xf32> to vector<8x32xbf16>
    %21 = arith.truncf %17 : vector<8x32xf32> to vector<8x32xbf16>
    %22 = vector.extract_strided_slice %19 {offsets = [0, 0], sizes = [8, 8], strides = [1, 1]} : vector<8x32xbf16> to vector<8x8xbf16>
    %23 = vector.extract_strided_slice %20 {offsets = [0, 0], sizes = [8, 8], strides = [1, 1]} : vector<8x32xbf16> to vector<8x8xbf16>
    %24 = vector.extract_strided_slice %21 {offsets = [0, 0], sizes = [8, 8], strides = [1, 1]} : vector<8x32xbf16> to vector<8x8xbf16>
    %cst_16 = arith.constant dense<0.000000e+00> : vector<8x8xf32>
    %25 = tpu.matmul %22, %23, %cst_16 {dimension_numbers = #tpu.dot_dimension_numbers<[1], [1], [0], [0], [0, 0, 1, 0], [], []>} : vector<8x8xbf16>, vector<8x8xbf16>, vector<8x8xf32> -> vector<8x8xf32>
    %cst_17 = arith.constant 0.353553385 : f32
    %26 = vector.broadcast %cst_17 : f32 to vector<8x8xf32>
    %27 = arith.mulf %25, %26 : vector<8x8xf32>
    %28 = arith.addf %27, %18 : vector<8x8xf32>
    %cst_18 = arith.constant dense<0xFF800000> : vector<8xf32>
    %29 = vector.multi_reduction <maximumf>, %28, %cst_18 [1] : vector<8x8xf32> to vector<8xf32>
    %30 = vector.shape_cast %29 : vector<8xf32> to vector<8x1xf32>
    %31 = vector.broadcast %30 : vector<8x1xf32> to vector<8x8xf32>
    %32 = arith.subf %28, %31 : vector<8x8xf32>
    %33 = math.exp %32 : vector<8x8xf32>
    %cst_19 = arith.constant dense<0.000000e+00> : vector<8xf32>
    %34 = vector.multi_reduction <add>, %33, %cst_19 [1] : vector<8x8xf32> to vector<8xf32>
    %35 = vector.shape_cast %34 : vector<8xf32> to vector<8x1xf32>
    %36 = tpu.reciprocal %35 {approx = true} : vector<8x1xf32> -> vector<8x1xf32>
    %37 = vector.broadcast %36 : vector<8x1xf32> to vector<8x8xf32>
    %38 = arith.mulf %33, %37 : vector<8x8xf32>
    %39 = arith.truncf %38 : vector<8x8xf32> to vector<8x8xbf16>
    %cst_20 = arith.constant dense<0.000000e+00> : vector<8x8xf32>
    %40 = tpu.matmul %39, %24, %cst_20 {dimension_numbers = #tpu.dot_dimension_numbers<[1], [0], [0], [1], [0, 0, 1, 1], [], []>} : vector<8x8xbf16>, vector<8x8xbf16>, vector<8x8xf32> -> vector<8x8xf32>
    %41 = vector.extract_strided_slice %19 {offsets = [0, 8], sizes = [8, 8], strides = [1, 1]} : vector<8x32xbf16> to vector<8x8xbf16>
    %42 = vector.extract_strided_slice %20 {offsets = [0, 8], sizes = [8, 8], strides = [1, 1]} : vector<8x32xbf16> to vector<8x8xbf16>
    %43 = vector.extract_strided_slice %21 {offsets = [0, 8], sizes = [8, 8], strides = [1, 1]} : vector<8x32xbf16> to vector<8x8xbf16>
    %cst_21 = arith.constant dense<0.000000e+00> : vector<8x8xf32>
    %44 = tpu.matmul %41, %42, %cst_21 {dimension_numbers = #tpu.dot_dimension_numbers<[1], [1], [0], [0], [0, 0, 1, 0], [], []>} : vector<8x8xbf16>, vector<8x8xbf16>, vector<8x8xf32> -> vector<8x8xf32>
    %cst_22 = arith.constant 0.353553385 : f32
    %45 = vector.broadcast %cst_22 : f32 to vector<8x8xf32>
    %46 = arith.mulf %44, %45 : vector<8x8xf32>
    %47 = arith.addf %46, %18 : vector<8x8xf32>
    %cst_23 = arith.constant dense<0xFF800000> : vector<8xf32>
    %48 = vector.multi_reduction <maximumf>, %47, %cst_23 [1] : vector<8x8xf32> to vector<8xf32>
    %49 = vector.shape_cast %48 : vector<8xf32> to vector<8x1xf32>
    %50 = vector.broadcast %49 : vector<8x1xf32> to vector<8x8xf32>
    %51 = arith.subf %47, %50 : vector<8x8xf32>
    %52 = math.exp %51 : vector<8x8xf32>
    %cst_24 = arith.constant dense<0.000000e+00> : vector<8xf32>
    %53 = vector.multi_reduction <add>, %52, %cst_24 [1] : vector<8x8xf32> to vector<8xf32>
    %54 = vector.shape_cast %53 : vector<8xf32> to vector<8x1xf32>
    %55 = tpu.reciprocal %54 {approx = true} : vector<8x1xf32> -> vector<8x1xf32>
    %56 = vector.broadcast %55 : vector<8x1xf32> to vector<8x8xf32>
    %57 = arith.mulf %52, %56 : vector<8x8xf32>
    %58 = arith.truncf %57 : vector<8x8xf32> to vector<8x8xbf16>
    %cst_25 = arith.constant dense<0.000000e+00> : vector<8x8xf32>
    %59 = tpu.matmul %58, %43, %cst_25 {dimension_numbers = #tpu.dot_dimension_numbers<[1], [0], [0], [1], [0, 0, 1, 1], [], []>} : vector<8x8xbf16>, vector<8x8xbf16>, vector<8x8xf32> -> vector<8x8xf32>
    %60 = vector.extract_strided_slice %19 {offsets = [0, 16], sizes = [8, 8], strides = [1, 1]} : vector<8x32xbf16> to vector<8x8xbf16>
    %61 = vector.extract_strided_slice %20 {offsets = [0, 16], sizes = [8, 8], strides = [1, 1]} : vector<8x32xbf16> to vector<8x8xbf16>
    %62 = vector.extract_strided_slice %21 {offsets = [0, 16], sizes = [8, 8], strides = [1, 1]} : vector<8x32xbf16> to vector<8x8xbf16>
    %cst_26 = arith.constant dense<0.000000e+00> : vector<8x8xf32>
    %63 = tpu.matmul %60, %61, %cst_26 {dimension_numbers = #tpu.dot_dimension_numbers<[1], [1], [0], [0], [0, 0, 1, 0], [], []>} : vector<8x8xbf16>, vector<8x8xbf16>, vector<8x8xf32> -> vector<8x8xf32>
    %cst_27 = arith.constant 0.353553385 : f32
    %64 = vector.broadcast %cst_27 : f32 to vector<8x8xf32>
    %65 = arith.mulf %63, %64 : vector<8x8xf32>
    %66 = arith.addf %65, %18 : vector<8x8xf32>
    %cst_28 = arith.constant dense<0xFF800000> : vector<8xf32>
    %67 = vector.multi_reduction <maximumf>, %66, %cst_28 [1] : vector<8x8xf32> to vector<8xf32>
    %68 = vector.shape_cast %67 : vector<8xf32> to vector<8x1xf32>
    %69 = vector.broadcast %68 : vector<8x1xf32> to vector<8x8xf32>
    %70 = arith.subf %66, %69 : vector<8x8xf32>
    %71 = math.exp %70 : vector<8x8xf32>
    %cst_29 = arith.constant dense<0.000000e+00> : vector<8xf32>
    %72 = vector.multi_reduction <add>, %71, %cst_29 [1] : vector<8x8xf32> to vector<8xf32>
    %73 = vector.shape_cast %72 : vector<8xf32> to vector<8x1xf32>
    %74 = tpu.reciprocal %73 {approx = true} : vector<8x1xf32> -> vector<8x1xf32>
    %75 = vector.broadcast %74 : vector<8x1xf32> to vector<8x8xf32>
    %76 = arith.mulf %71, %75 : vector<8x8xf32>
    %77 = arith.truncf %76 : vector<8x8xf32> to vector<8x8xbf16>
    %cst_30 = arith.constant dense<0.000000e+00> : vector<8x8xf32>
    %78 = tpu.matmul %77, %62, %cst_30 {dimension_numbers = #tpu.dot_dimension_numbers<[1], [0], [0], [1], [0, 0, 1, 1], [], []>} : vector<8x8xbf16>, vector<8x8xbf16>, vector<8x8xf32> -> vector<8x8xf32>
    %79 = vector.extract_strided_slice %19 {offsets = [0, 24], sizes = [8, 8], strides = [1, 1]} : vector<8x32xbf16> to vector<8x8xbf16>
    %80 = vector.extract_strided_slice %20 {offsets = [0, 24], sizes = [8, 8], strides = [1, 1]} : vector<8x32xbf16> to vector<8x8xbf16>
    %81 = vector.extract_strided_slice %21 {offsets = [0, 24], sizes = [8, 8], strides = [1, 1]} : vector<8x32xbf16> to vector<8x8xbf16>
    %cst_31 = arith.constant dense<0.000000e+00> : vector<8x8xf32>
    %82 = tpu.matmul %79, %80, %cst_31 {dimension_numbers = #tpu.dot_dimension_numbers<[1], [1], [0], [0], [0, 0, 1, 0], [], []>} : vector<8x8xbf16>, vector<8x8xbf16>, vector<8x8xf32> -> vector<8x8xf32>
    %cst_32 = arith.constant 0.353553385 : f32
    %83 = vector.broadcast %cst_32 : f32 to vector<8x8xf32>
    %84 = arith.mulf %82, %83 : vector<8x8xf32>
    %85 = arith.addf %84, %18 : vector<8x8xf32>
    %cst_33 = arith.constant dense<0xFF800000> : vector<8xf32>
    %86 = vector.multi_reduction <maximumf>, %85, %cst_33 [1] : vector<8x8xf32> to vector<8xf32>
    %87 = vector.shape_cast %86 : vector<8xf32> to vector<8x1xf32>
    %88 = vector.broadcast %87 : vector<8x1xf32> to vector<8x8xf32>
    %89 = arith.subf %85, %88 : vector<8x8xf32>
    %90 = math.exp %89 : vector<8x8xf32>
    %cst_34 = arith.constant dense<0.000000e+00> : vector<8xf32>
    %91 = vector.multi_reduction <add>, %90, %cst_34 [1] : vector<8x8xf32> to vector<8xf32>
    %92 = vector.shape_cast %91 : vector<8xf32> to vector<8x1xf32>
    %93 = tpu.reciprocal %92 {approx = true} : vector<8x1xf32> -> vector<8x1xf32>
    %94 = vector.broadcast %93 : vector<8x1xf32> to vector<8x8xf32>
    %95 = arith.mulf %90, %94 : vector<8x8xf32>
    %96 = arith.truncf %95 : vector<8x8xf32> to vector<8x8xbf16>
    %cst_35 = arith.constant dense<0.000000e+00> : vector<8x8xf32>
    %97 = tpu.matmul %96, %81, %cst_35 {dimension_numbers = #tpu.dot_dimension_numbers<[1], [0], [0], [1], [0, 0, 1, 1], [], []>} : vector<8x8xbf16>, vector<8x8xbf16>, vector<8x8xf32> -> vector<8x8xf32>
    %98 = tpu.concatenate %40, %59, %78, %97 in 1 : vector<8x8xf32>, vector<8x8xf32>, vector<8x8xf32>, vector<8x8xf32> -> vector<8x32xf32>
    %99 = arith.truncf %98 : vector<8x32xf32> to vector<8x32xbf16>
    %c0_36 = arith.constant 0 : index
    %c0_37 = arith.constant 0 : index
    %100 = vector.load %arg6[%c0_36, %c0_37] : memref<32x32xbf16, #tpu.memory_space<vmem>>, vector<32x32xbf16>
    %cst_38 = arith.constant dense<0.000000e+00> : vector<8x32xf32>
    %101 = tpu.matmul %99, %100, %cst_38 {dimension_numbers = #tpu.dot_dimension_numbers<[1], [0], [0], [1], [0, 0, 1, 1], [], []>} : vector<8x32xbf16>, vector<32x32xbf16>, vector<8x32xf32> -> vector<8x32xf32>
    %c0_39 = arith.constant 0 : index
    %c0_40 = arith.constant 0 : index
    %102 = vector.load %arg9[%c0_39, %c0_40] : memref<1x32xf32, #tpu.memory_space<vmem>>, vector<1x32xf32>
    %103 = vector.broadcast %102 : vector<1x32xf32> to vector<8x32xf32>
    %104 = arith.addf %101, %103 : vector<8x32xf32>
    %105 = arith.addf %1, %104 : vector<8x32xf32>
    %cst_41 = arith.constant dense<0.000000e+00> : vector<8xf32>
    %106 = vector.multi_reduction <add>, %105, %cst_41 [1] : vector<8x32xf32> to vector<8xf32>
    %107 = vector.shape_cast %106 : vector<8xf32> to vector<8x1xf32>
    %cst_42 = arith.constant 3.200000e+01 : f32
    %108 = vector.broadcast %cst_42 : f32 to vector<8x1xf32>
    %109 = arith.divf %107, %108 : vector<8x1xf32>
    %110 = vector.broadcast %109 : vector<8x1xf32> to vector<8x32xf32>
    %111 = arith.subf %105, %110 : vector<8x32xf32>
    %112 = arith.mulf %111, %111 : vector<8x32xf32>
    %cst_43 = arith.constant dense<0.000000e+00> : vector<8xf32>
    %113 = vector.multi_reduction <add>, %112, %cst_43 [1] : vector<8x32xf32> to vector<8xf32>
    %114 = vector.shape_cast %113 : vector<8xf32> to vector<8x1xf32>
    %cst_44 = arith.constant 3.200000e+01 : f32
    %115 = vector.broadcast %cst_44 : f32 to vector<8x1xf32>
    %116 = arith.divf %114, %115 : vector<8x1xf32>
    %cst_45 = arith.constant 9.99999974E-6 : f32
    %117 = vector.broadcast %cst_45 : f32 to vector<8x1xf32>
    %118 = arith.addf %116, %117 : vector<8x1xf32>
    %119 = math.rsqrt %118 : vector<8x1xf32>
    %120 = vector.broadcast %119 : vector<8x1xf32> to vector<8x32xf32>
    %121 = arith.mulf %111, %120 : vector<8x32xf32>
    %c0_46 = arith.constant 0 : index
    %c0_47 = arith.constant 0 : index
    %122 = vector.load %arg10[%c0_46, %c0_47] : memref<1x32xf32, #tpu.memory_space<vmem>>, vector<1x32xf32>
    %123 = vector.broadcast %122 : vector<1x32xf32> to vector<8x32xf32>
    %124 = arith.mulf %121, %123 : vector<8x32xf32>
    %c0_48 = arith.constant 0 : index
    %c0_49 = arith.constant 0 : index
    %125 = vector.load %arg11[%c0_48, %c0_49] : memref<1x32xf32, #tpu.memory_space<vmem>>, vector<1x32xf32>
    %126 = vector.broadcast %125 : vector<1x32xf32> to vector<8x32xf32>
    %127 = arith.addf %124, %126 : vector<8x32xf32>
    %c0_50 = arith.constant 0 : index
    %c0_51 = arith.constant 0 : index
    %c0_52 = arith.constant 0 : index
    %128 = vector.load %arg12[%c0_50, %c0_51, %c0_52] : memref<1x8x32xf32, #tpu.memory_space<vmem>>, vector<1x8x32xf32>
    %129 = vector.shape_cast %128 : vector<1x8x32xf32> to vector<8x32xf32>
    %130 = vector.shape_cast %127 : vector<8x32xf32> to vector<1x8x32xf32>
    tpu.vector_store %arg12[%c0_50, %c0_51, %c0_52], %130 {strides = array<i32>} : memref<1x8x32xf32, #tpu.memory_space<vmem>>, vector<1x8x32xf32>,
    return
  }
  func.func @transform_0(%arg0: i32) -> (i32, i32, i32) {
    %c0_i32 = arith.constant 0 : i32
    %c0_i32_0 = arith.constant 0 : i32
    %c0_i32_1 = arith.constant 0 : i32
    return %arg0, %c0_i32, %c0_i32_0 : i32, i32, i32
  }
  func.func @transform_1(%arg0: i32) -> (i32, i32, i32) {
    %c0_i32 = arith.constant 0 : i32
    %c0_i32_0 = arith.constant 0 : i32
    %c0_i32_1 = arith.constant 0 : i32
    return %arg0, %c0_i32, %c0_i32_0 : i32, i32, i32
  }
  func.func @transform_2(%arg0: i32) -> (i32, i32) {
    %c0_i32 = arith.constant 0 : i32
    %c0_i32_0 = arith.constant 0 : i32
    %c0_i32_1 = arith.constant 0 : i32
    return %c0_i32, %c0_i32_0 : i32, i32
  }
  func.func @transform_3(%arg0: i32) -> (i32, i32) {
    %c0_i32 = arith.constant 0 : i32
    %c0_i32_0 = arith.constant 0 : i32
    %c0_i32_1 = arith.constant 0 : i32
    return %c0_i32, %c0_i32_0 : i32, i32
  }
  func.func @transform_4(%arg0: i32) -> (i32, i32) {
    %c0_i32 = arith.constant 0 : i32
    %c0_i32_0 = arith.constant 0 : i32
    %c0_i32_1 = arith.constant 0 : i32
    return %c0_i32, %c0_i32_0 : i32, i32
  }
  func.func @transform_5(%arg0: i32) -> (i32, i32) {
    %c0_i32 = arith.constant 0 : i32
    %c0_i32_0 = arith.constant 0 : i32
    %c0_i32_1 = arith.constant 0 : i32
    return %c0_i32, %c0_i32_0 : i32, i32
  }
  func.func @transform_6(%arg0: i32) -> (i32, i32) {
    %c0_i32 = arith.constant 0 : i32
    %c0_i32_0 = arith.constant 0 : i32
    %c0_i32_1 = arith.constant 0 : i32
    return %c0_i32, %c0_i32_0 : i32, i32
  }
  func.func @transform_7(%arg0: i32) -> (i32, i32) {
    %c0_i32 = arith.constant 0 : i32
    %c0_i32_0 = arith.constant 0 : i32
    %c0_i32_1 = arith.constant 0 : i32
    return %c0_i32, %c0_i32_0 : i32, i32
  }
  func.func @transform_8(%arg0: i32) -> (i32, i32) {
    %c0_i32 = arith.constant 0 : i32
    %c0_i32_0 = arith.constant 0 : i32
    %c0_i32_1 = arith.constant 0 : i32
    return %c0_i32, %c0_i32_0 : i32, i32
  }
  func.func @transform_9(%arg0: i32) -> (i32, i32) {
    %c0_i32 = arith.constant 0 : i32
    %c0_i32_0 = arith.constant 0 : i32
    %c0_i32_1 = arith.constant 0 : i32
    return %c0_i32, %c0_i32_0 : i32, i32
  }
  func.func @transform_10(%arg0: i32) -> (i32, i32) {
    %c0_i32 = arith.constant 0 : i32
    %c0_i32_0 = arith.constant 0 : i32
    %c0_i32_1 = arith.constant 0 : i32
    return %c0_i32, %c0_i32_0 : i32, i32
  }
  func.func @transform_11(%arg0: i32) -> (i32, i32, i32) {
    %c0_i32 = arith.constant 0 : i32
    %c0_i32_0 = arith.constant 0 : i32
    %c0_i32_1 = arith.constant 0 : i32
    return %arg0, %c0_i32, %c0_i32_0 : i32, i32, i32
  }
}

module attributes {stable_mosaic.version = 11 : i64} {
  func.func @_mha_ln_kernel(%arg0: i32, %arg1: memref<1x8x32xf32, #tpu.memory_space<vmem>>, %arg2: memref<1x10x32xf32, #tpu.memory_space<vmem>>, %arg3: memref<8x10xf32, #tpu.memory_space<vmem>>, %arg4: memref<32x32xbf16, #tpu.memory_space<vmem>>, %arg5: memref<32x64xbf16, #tpu.memory_space<vmem>>, %arg6: memref<32x32xbf16, #tpu.memory_space<vmem>>, %arg7: memref<1x32xf32, #tpu.memory_space<vmem>>, %arg8: memref<1x64xf32, #tpu.memory_space<vmem>>, %arg9: memref<1x32xf32, #tpu.memory_space<vmem>>, %arg10: memref<1x32xf32, #tpu.memory_space<vmem>>, %arg11: memref<1x32xf32, #tpu.memory_space<vmem>>, %arg12: memref<1x8x32xf32, #tpu.memory_space<vmem>>) attributes {dimension_semantics = [#tpu.dimension_semantics<parallel>], iteration_bounds = array<i64: 2>, scalar_prefetch = 0 : i64, scratch_operands = 0 : i64, tpu.core_type = #tpu.core_type<tc>, window_params = [{transform_indices = @transform_0, window_bounds = array<i64: 1, 8, 32>}, {transform_indices = @transform_1, window_bounds = array<i64: 1, 10, 32>}, {pipeline_mode = #tpu.pipeline_mode<synchronous>, transform_indices = @transform_2, window_bounds = array<i64: 8, 10>}, {pipeline_mode = #tpu.pipeline_mode<synchronous>, transform_indices = @transform_3, window_bounds = array<i64: 32, 32>}, {pipeline_mode = #tpu.pipeline_mode<synchronous>, transform_indices = @transform_4, window_bounds = array<i64: 32, 64>}, {pipeline_mode = #tpu.pipeline_mode<synchronous>, transform_indices = @transform_5, window_bounds = array<i64: 32, 32>}, {pipeline_mode = #tpu.pipeline_mode<synchronous>, transform_indices = @transform_6, window_bounds = array<i64: 1, 32>}, {pipeline_mode = #tpu.pipeline_mode<synchronous>, transform_indices = @transform_7, window_bounds = array<i64: 1, 64>}, {pipeline_mode = #tpu.pipeline_mode<synchronous>, transform_indices = @transform_8, window_bounds = array<i64: 1, 32>}, {pipeline_mode = #tpu.pipeline_mode<synchronous>, transform_indices = @transform_9, window_bounds = array<i64: 1, 32>}, {pipeline_mode = #tpu.pipeline_mode<synchronous>, transform_indices = @transform_10, window_bounds = array<i64: 1, 32>}, {transform_indices = @transform_11, window_bounds = array<i64: 1, 8, 32>}]} {
    %c0 = arith.constant 0 : index
    %c0_0 = arith.constant 0 : index
    %c0_1 = arith.constant 0 : index
    %0 = vector.load %arg1[%c0, %c0_0, %c0_1] : memref<1x8x32xf32, #tpu.memory_space<vmem>>, vector<1x8x32xf32>
    %1 = vector.shape_cast %0 : vector<1x8x32xf32> to vector<8x32xf32>
    %c0_2 = arith.constant 0 : index
    %c0_3 = arith.constant 0 : index
    %c0_4 = arith.constant 0 : index
    %2 = vector.load %arg2[%c0_2, %c0_3, %c0_4] : memref<1x10x32xf32, #tpu.memory_space<vmem>>, vector<1x10x32xf32>
    %3 = vector.shape_cast %2 : vector<1x10x32xf32> to vector<10x32xf32>
    %4 = arith.truncf %1 : vector<8x32xf32> to vector<8x32xbf16>
    %c0_5 = arith.constant 0 : index
    %c0_6 = arith.constant 0 : index
    %5 = vector.load %arg4[%c0_5, %c0_6] : memref<32x32xbf16, #tpu.memory_space<vmem>>, vector<32x32xbf16>
    %cst = arith.constant dense<0.000000e+00> : vector<8x32xf32>
    %6 = tpu.matmul %4, %5, %cst {dimension_numbers = #tpu.dot_dimension_numbers<[1], [0], [0], [1], [0, 0, 1, 1], [], []>} : vector<8x32xbf16>, vector<32x32xbf16>, vector<8x32xf32> -> vector<8x32xf32>
    %c0_7 = arith.constant 0 : index
    %c0_8 = arith.constant 0 : index
    %7 = vector.load %arg7[%c0_7, %c0_8] : memref<1x32xf32, #tpu.memory_space<vmem>>, vector<1x32xf32>
    %8 = vector.broadcast %7 : vector<1x32xf32> to vector<8x32xf32>
    %9 = arith.addf %6, %8 : vector<8x32xf32>
    %10 = arith.truncf %3 : vector<10x32xf32> to vector<10x32xbf16>
    %c0_9 = arith.constant 0 : index
    %c0_10 = arith.constant 0 : index
    %11 = vector.load %arg5[%c0_9, %c0_10] : memref<32x64xbf16, #tpu.memory_space<vmem>>, vector<32x64xbf16>
    %cst_11 = arith.constant dense<0.000000e+00> : vector<10x64xf32>
    %12 = tpu.matmul %10, %11, %cst_11 {dimension_numbers = #tpu.dot_dimension_numbers<[1], [0], [0], [1], [0, 0, 1, 1], [], []>} : vector<10x32xbf16>, vector<32x64xbf16>, vector<10x64xf32> -> vector<10x64xf32>
    %c0_12 = arith.constant 0 : index
    %c0_13 = arith.constant 0 : index
    %13 = vector.load %arg8[%c0_12, %c0_13] : memref<1x64xf32, #tpu.memory_space<vmem>>, vector<1x64xf32>
    %14 = vector.broadcast %13 : vector<1x64xf32> to vector<10x64xf32>
    %15 = arith.addf %12, %14 : vector<10x64xf32>
    %16 = vector.extract_strided_slice %15 {offsets = [0, 0], sizes = [10, 32], strides = [1, 1]} : vector<10x64xf32> to vector<10x32xf32>
    %17 = vector.extract_strided_slice %15 {offsets = [0, 32], sizes = [10, 32], strides = [1, 1]} : vector<10x64xf32> to vector<10x32xf32>
    %c0_14 = arith.constant 0 : index
    %c0_15 = arith.constant 0 : index
    %18 = vector.load %arg3[%c0_14, %c0_15] : memref<8x10xf32, #tpu.memory_space<vmem>>, vector<8x10xf32>
    %19 = arith.truncf %9 : vector<8x32xf32> to vector<8x32xbf16>
    %20 = arith.truncf %16 : vector<10x32xf32> to vector<10x32xbf16>
    %21 = arith.truncf %17 : vector<10x32xf32> to vector<10x32xbf16>
    %22 = vector.extract_strided_slice %19 {offsets = [0, 0], sizes = [8, 8], strides = [1, 1]} : vector<8x32xbf16> to vector<8x8xbf16>
    %23 = vector.extract_strided_slice %20 {offsets = [0, 0], sizes = [10, 8], strides = [1, 1]} : vector<10x32xbf16> to vector<10x8xbf16>
    %24 = vector.extract_strided_slice %21 {offsets = [0, 0], sizes = [10, 8], strides = [1, 1]} : vector<10x32xbf16> to vector<10x8xbf16>
    %cst_16 = arith.constant dense<0.000000e+00> : vector<8x10xf32>
    %25 = tpu.matmul %22, %23, %cst_16 {dimension_numbers = #tpu.dot_dimension_numbers<[1], [1], [0], [0], [0, 0, 1, 0], [], []>} : vector<8x8xbf16>, vector<10x8xbf16>, vector<8x10xf32> -> vector<8x10xf32>
    %cst_17 = arith.constant 0.353553385 : f32
    %26 = vector.broadcast %cst_17 : f32 to vector<8x10xf32>
    %27 = arith.mulf %25, %26 : vector<8x10xf32>
    %28 = arith.addf %27, %18 : vector<8x10xf32>
    %cst_18 = arith.constant dense<0xFF800000> : vector<8xf32>
    %29 = vector.multi_reduction <maximumf>, %28, %cst_18 [1] : vector<8x10xf32> to vector<8xf32>
    %30 = vector.shape_cast %29 : vector<8xf32> to vector<8x1xf32>
    %31 = vector.broadcast %30 : vector<8x1xf32> to vector<8x10xf32>
    %32 = arith.subf %28, %31 : vector<8x10xf32>
    %33 = math.exp %32 : vector<8x10xf32>
    %cst_19 = arith.constant dense<0.000000e+00> : vector<8xf32>
    %34 = vector.multi_reduction <add>, %33, %cst_19 [1] : vector<8x10xf32> to vector<8xf32>
    %35 = vector.shape_cast %34 : vector<8xf32> to vector<8x1xf32>
    %36 = tpu.reciprocal %35 {approx = true} : vector<8x1xf32> -> vector<8x1xf32>
    %37 = vector.broadcast %36 : vector<8x1xf32> to vector<8x10xf32>
    %38 = arith.mulf %33, %37 : vector<8x10xf32>
    %39 = arith.truncf %38 : vector<8x10xf32> to vector<8x10xbf16>
    %cst_20 = arith.constant dense<0.000000e+00> : vector<8x8xf32>
    %40 = tpu.matmul %39, %24, %cst_20 {dimension_numbers = #tpu.dot_dimension_numbers<[1], [0], [0], [1], [0, 0, 1, 1], [], []>} : vector<8x10xbf16>, vector<10x8xbf16>, vector<8x8xf32> -> vector<8x8xf32>
    %41 = vector.extract_strided_slice %19 {offsets = [0, 8], sizes = [8, 8], strides = [1, 1]} : vector<8x32xbf16> to vector<8x8xbf16>
    %42 = vector.extract_strided_slice %20 {offsets = [0, 8], sizes = [10, 8], strides = [1, 1]} : vector<10x32xbf16> to vector<10x8xbf16>
    %43 = vector.extract_strided_slice %21 {offsets = [0, 8], sizes = [10, 8], strides = [1, 1]} : vector<10x32xbf16> to vector<10x8xbf16>
    %cst_21 = arith.constant dense<0.000000e+00> : vector<8x10xf32>
    %44 = tpu.matmul %41, %42, %cst_21 {dimension_numbers = #tpu.dot_dimension_numbers<[1], [1], [0], [0], [0, 0, 1, 0], [], []>} : vector<8x8xbf16>, vector<10x8xbf16>, vector<8x10xf32> -> vector<8x10xf32>
    %cst_22 = arith.constant 0.353553385 : f32
    %45 = vector.broadcast %cst_22 : f32 to vector<8x10xf32>
    %46 = arith.mulf %44, %45 : vector<8x10xf32>
    %47 = arith.addf %46, %18 : vector<8x10xf32>
    %cst_23 = arith.constant dense<0xFF800000> : vector<8xf32>
    %48 = vector.multi_reduction <maximumf>, %47, %cst_23 [1] : vector<8x10xf32> to vector<8xf32>
    %49 = vector.shape_cast %48 : vector<8xf32> to vector<8x1xf32>
    %50 = vector.broadcast %49 : vector<8x1xf32> to vector<8x10xf32>
    %51 = arith.subf %47, %50 : vector<8x10xf32>
    %52 = math.exp %51 : vector<8x10xf32>
    %cst_24 = arith.constant dense<0.000000e+00> : vector<8xf32>
    %53 = vector.multi_reduction <add>, %52, %cst_24 [1] : vector<8x10xf32> to vector<8xf32>
    %54 = vector.shape_cast %53 : vector<8xf32> to vector<8x1xf32>
    %55 = tpu.reciprocal %54 {approx = true} : vector<8x1xf32> -> vector<8x1xf32>
    %56 = vector.broadcast %55 : vector<8x1xf32> to vector<8x10xf32>
    %57 = arith.mulf %52, %56 : vector<8x10xf32>
    %58 = arith.truncf %57 : vector<8x10xf32> to vector<8x10xbf16>
    %cst_25 = arith.constant dense<0.000000e+00> : vector<8x8xf32>
    %59 = tpu.matmul %58, %43, %cst_25 {dimension_numbers = #tpu.dot_dimension_numbers<[1], [0], [0], [1], [0, 0, 1, 1], [], []>} : vector<8x10xbf16>, vector<10x8xbf16>, vector<8x8xf32> -> vector<8x8xf32>
    %60 = vector.extract_strided_slice %19 {offsets = [0, 16], sizes = [8, 8], strides = [1, 1]} : vector<8x32xbf16> to vector<8x8xbf16>
    %61 = vector.extract_strided_slice %20 {offsets = [0, 16], sizes = [10, 8], strides = [1, 1]} : vector<10x32xbf16> to vector<10x8xbf16>
    %62 = vector.extract_strided_slice %21 {offsets = [0, 16], sizes = [10, 8], strides = [1, 1]} : vector<10x32xbf16> to vector<10x8xbf16>
    %cst_26 = arith.constant dense<0.000000e+00> : vector<8x10xf32>
    %63 = tpu.matmul %60, %61, %cst_26 {dimension_numbers = #tpu.dot_dimension_numbers<[1], [1], [0], [0], [0, 0, 1, 0], [], []>} : vector<8x8xbf16>, vector<10x8xbf16>, vector<8x10xf32> -> vector<8x10xf32>
    %cst_27 = arith.constant 0.353553385 : f32
    %64 = vector.broadcast %cst_27 : f32 to vector<8x10xf32>
    %65 = arith.mulf %63, %64 : vector<8x10xf32>
    %66 = arith.addf %65, %18 : vector<8x10xf32>
    %cst_28 = arith.constant dense<0xFF800000> : vector<8xf32>
    %67 = vector.multi_reduction <maximumf>, %66, %cst_28 [1] : vector<8x10xf32> to vector<8xf32>
    %68 = vector.shape_cast %67 : vector<8xf32> to vector<8x1xf32>
    %69 = vector.broadcast %68 : vector<8x1xf32> to vector<8x10xf32>
    %70 = arith.subf %66, %69 : vector<8x10xf32>
    %71 = math.exp %70 : vector<8x10xf32>
    %cst_29 = arith.constant dense<0.000000e+00> : vector<8xf32>
    %72 = vector.multi_reduction <add>, %71, %cst_29 [1] : vector<8x10xf32> to vector<8xf32>
    %73 = vector.shape_cast %72 : vector<8xf32> to vector<8x1xf32>
    %74 = tpu.reciprocal %73 {approx = true} : vector<8x1xf32> -> vector<8x1xf32>
    %75 = vector.broadcast %74 : vector<8x1xf32> to vector<8x10xf32>
    %76 = arith.mulf %71, %75 : vector<8x10xf32>
    %77 = arith.truncf %76 : vector<8x10xf32> to vector<8x10xbf16>
    %cst_30 = arith.constant dense<0.000000e+00> : vector<8x8xf32>
    %78 = tpu.matmul %77, %62, %cst_30 {dimension_numbers = #tpu.dot_dimension_numbers<[1], [0], [0], [1], [0, 0, 1, 1], [], []>} : vector<8x10xbf16>, vector<10x8xbf16>, vector<8x8xf32> -> vector<8x8xf32>
    %79 = vector.extract_strided_slice %19 {offsets = [0, 24], sizes = [8, 8], strides = [1, 1]} : vector<8x32xbf16> to vector<8x8xbf16>
    %80 = vector.extract_strided_slice %20 {offsets = [0, 24], sizes = [10, 8], strides = [1, 1]} : vector<10x32xbf16> to vector<10x8xbf16>
    %81 = vector.extract_strided_slice %21 {offsets = [0, 24], sizes = [10, 8], strides = [1, 1]} : vector<10x32xbf16> to vector<10x8xbf16>
    %cst_31 = arith.constant dense<0.000000e+00> : vector<8x10xf32>
    %82 = tpu.matmul %79, %80, %cst_31 {dimension_numbers = #tpu.dot_dimension_numbers<[1], [1], [0], [0], [0, 0, 1, 0], [], []>} : vector<8x8xbf16>, vector<10x8xbf16>, vector<8x10xf32> -> vector<8x10xf32>
    %cst_32 = arith.constant 0.353553385 : f32
    %83 = vector.broadcast %cst_32 : f32 to vector<8x10xf32>
    %84 = arith.mulf %82, %83 : vector<8x10xf32>
    %85 = arith.addf %84, %18 : vector<8x10xf32>
    %cst_33 = arith.constant dense<0xFF800000> : vector<8xf32>
    %86 = vector.multi_reduction <maximumf>, %85, %cst_33 [1] : vector<8x10xf32> to vector<8xf32>
    %87 = vector.shape_cast %86 : vector<8xf32> to vector<8x1xf32>
    %88 = vector.broadcast %87 : vector<8x1xf32> to vector<8x10xf32>
    %89 = arith.subf %85, %88 : vector<8x10xf32>
    %90 = math.exp %89 : vector<8x10xf32>
    %cst_34 = arith.constant dense<0.000000e+00> : vector<8xf32>
    %91 = vector.multi_reduction <add>, %90, %cst_34 [1] : vector<8x10xf32> to vector<8xf32>
    %92 = vector.shape_cast %91 : vector<8xf32> to vector<8x1xf32>
    %93 = tpu.reciprocal %92 {approx = true} : vector<8x1xf32> -> vector<8x1xf32>
    %94 = vector.broadcast %93 : vector<8x1xf32> to vector<8x10xf32>
    %95 = arith.mulf %90, %94 : vector<8x10xf32>
    %96 = arith.truncf %95 : vector<8x10xf32> to vector<8x10xbf16>
    %cst_35 = arith.constant dense<0.000000e+00> : vector<8x8xf32>
    %97 = tpu.matmul %96, %81, %cst_35 {dimension_numbers = #tpu.dot_dimension_numbers<[1], [0], [0], [1], [0, 0, 1, 1], [], []>} : vector<8x10xbf16>, vector<10x8xbf16>, vector<8x8xf32> -> vector<8x8xf32>
    %98 = tpu.concatenate %40, %59, %78, %97 in 1 : vector<8x8xf32>, vector<8x8xf32>, vector<8x8xf32>, vector<8x8xf32> -> vector<8x32xf32>
    %99 = arith.truncf %98 : vector<8x32xf32> to vector<8x32xbf16>
    %c0_36 = arith.constant 0 : index
    %c0_37 = arith.constant 0 : index
    %100 = vector.load %arg6[%c0_36, %c0_37] : memref<32x32xbf16, #tpu.memory_space<vmem>>, vector<32x32xbf16>
    %cst_38 = arith.constant dense<0.000000e+00> : vector<8x32xf32>
    %101 = tpu.matmul %99, %100, %cst_38 {dimension_numbers = #tpu.dot_dimension_numbers<[1], [0], [0], [1], [0, 0, 1, 1], [], []>} : vector<8x32xbf16>, vector<32x32xbf16>, vector<8x32xf32> -> vector<8x32xf32>
    %c0_39 = arith.constant 0 : index
    %c0_40 = arith.constant 0 : index
    %102 = vector.load %arg9[%c0_39, %c0_40] : memref<1x32xf32, #tpu.memory_space<vmem>>, vector<1x32xf32>
    %103 = vector.broadcast %102 : vector<1x32xf32> to vector<8x32xf32>
    %104 = arith.addf %101, %103 : vector<8x32xf32>
    %105 = arith.addf %1, %104 : vector<8x32xf32>
    %cst_41 = arith.constant dense<0.000000e+00> : vector<8xf32>
    %106 = vector.multi_reduction <add>, %105, %cst_41 [1] : vector<8x32xf32> to vector<8xf32>
    %107 = vector.shape_cast %106 : vector<8xf32> to vector<8x1xf32>
    %cst_42 = arith.constant 3.200000e+01 : f32
    %108 = vector.broadcast %cst_42 : f32 to vector<8x1xf32>
    %109 = arith.divf %107, %108 : vector<8x1xf32>
    %110 = vector.broadcast %109 : vector<8x1xf32> to vector<8x32xf32>
    %111 = arith.subf %105, %110 : vector<8x32xf32>
    %112 = arith.mulf %111, %111 : vector<8x32xf32>
    %cst_43 = arith.constant dense<0.000000e+00> : vector<8xf32>
    %113 = vector.multi_reduction <add>, %112, %cst_43 [1] : vector<8x32xf32> to vector<8xf32>
    %114 = vector.shape_cast %113 : vector<8xf32> to vector<8x1xf32>
    %cst_44 = arith.constant 3.200000e+01 : f32
    %115 = vector.broadcast %cst_44 : f32 to vector<8x1xf32>
    %116 = arith.divf %114, %115 : vector<8x1xf32>
    %cst_45 = arith.constant 9.99999974E-6 : f32
    %117 = vector.broadcast %cst_45 : f32 to vector<8x1xf32>
    %118 = arith.addf %116, %117 : vector<8x1xf32>
    %119 = math.rsqrt %118 : vector<8x1xf32>
    %120 = vector.broadcast %119 : vector<8x1xf32> to vector<8x32xf32>
    %121 = arith.mulf %111, %120 : vector<8x32xf32>
    %c0_46 = arith.constant 0 : index
    %c0_47 = arith.constant 0 : index
    %122 = vector.load %arg10[%c0_46, %c0_47] : memref<1x32xf32, #tpu.memory_space<vmem>>, vector<1x32xf32>
    %123 = vector.broadcast %122 : vector<1x32xf32> to vector<8x32xf32>
    %124 = arith.mulf %121, %123 : vector<8x32xf32>
    %c0_48 = arith.constant 0 : index
    %c0_49 = arith.constant 0 : index
    %125 = vector.load %arg11[%c0_48, %c0_49] : memref<1x32xf32, #tpu.memory_space<vmem>>, vector<1x32xf32>
    %126 = vector.broadcast %125 : vector<1x32xf32> to vector<8x32xf32>
    %127 = arith.addf %124, %126 : vector<8x32xf32>
    %c0_50 = arith.constant 0 : index
    %c0_51 = arith.constant 0 : index
    %c0_52 = arith.constant 0 : index
    %128 = vector.load %arg12[%c0_50, %c0_51, %c0_52] : memref<1x8x32xf32, #tpu.memory_space<vmem>>, vector<1x8x32xf32>
    %129 = vector.shape_cast %128 : vector<1x8x32xf32> to vector<8x32xf32>
    %130 = vector.shape_cast %127 : vector<8x32xf32> to vector<1x8x32xf32>
    tpu.vector_store %arg12[%c0_50, %c0_51, %c0_52], %130 {strides = array<i32>} : memref<1x8x32xf32, #tpu.memory_space<vmem>>, vector<1x8x32xf32>,
    return
  }
  func.func @transform_0(%arg0: i32) -> (i32, i32, i32) {
    %c0_i32 = arith.constant 0 : i32
    %c0_i32_0 = arith.constant 0 : i32
    %c0_i32_1 = arith.constant 0 : i32
    return %arg0, %c0_i32, %c0_i32_0 : i32, i32, i32
  }
  func.func @transform_1(%arg0: i32) -> (i32, i32, i32) {
    %c0_i32 = arith.constant 0 : i32
    %c0_i32_0 = arith.constant 0 : i32
    %c0_i32_1 = arith.constant 0 : i32
    return %arg0, %c0_i32, %c0_i32_0 : i32, i32, i32
  }
  func.func @transform_2(%arg0: i32) -> (i32, i32) {
    %c0_i32 = arith.constant 0 : i32
    %c0_i32_0 = arith.constant 0 : i32
    %c0_i32_1 = arith.constant 0 : i32
    return %c0_i32, %c0_i32_0 : i32, i32
  }
  func.func @transform_3(%arg0: i32) -> (i32, i32) {
    %c0_i32 = arith.constant 0 : i32
    %c0_i32_0 = arith.constant 0 : i32
    %c0_i32_1 = arith.constant 0 : i32
    return %c0_i32, %c0_i32_0 : i32, i32
  }
  func.func @transform_4(%arg0: i32) -> (i32, i32) {
    %c0_i32 = arith.constant 0 : i32
    %c0_i32_0 = arith.constant 0 : i32
    %c0_i32_1 = arith.constant 0 : i32
    return %c0_i32, %c0_i32_0 : i32, i32
  }
  func.func @transform_5(%arg0: i32) -> (i32, i32) {
    %c0_i32 = arith.constant 0 : i32
    %c0_i32_0 = arith.constant 0 : i32
    %c0_i32_1 = arith.constant 0 : i32
    return %c0_i32, %c0_i32_0 : i32, i32
  }
  func.func @transform_6(%arg0: i32) -> (i32, i32) {
    %c0_i32 = arith.constant 0 : i32
    %c0_i32_0 = arith.constant 0 : i32
    %c0_i32_1 = arith.constant 0 : i32
    return %c0_i32, %c0_i32_0 : i32, i32
  }
  func.func @transform_7(%arg0: i32) -> (i32, i32) {
    %c0_i32 = arith.constant 0 : i32
    %c0_i32_0 = arith.constant 0 : i32
    %c0_i32_1 = arith.constant 0 : i32
    return %c0_i32, %c0_i32_0 : i32, i32
  }
  func.func @transform_8(%arg0: i32) -> (i32, i32) {
    %c0_i32 = arith.constant 0 : i32
    %c0_i32_0 = arith.constant 0 : i32
    %c0_i32_1 = arith.constant 0 : i32
    return %c0_i32, %c0_i32_0 : i32, i32
  }
  func.func @transform_9(%arg0: i32) -> (i32, i32) {
    %c0_i32 = arith.constant 0 : i32
    %c0_i32_0 = arith.constant 0 : i32
    %c0_i32_1 = arith.constant 0 : i32
    return %c0_i32, %c0_i32_0 : i32, i32
  }
  func.func @transform_10(%arg0: i32) -> (i32, i32) {
    %c0_i32 = arith.constant 0 : i32
    %c0_i32_0 = arith.constant 0 : i32
    %c0_i32_1 = arith.constant 0 : i32
    return %c0_i32, %c0_i32_0 : i32, i32
  }
  func.func @transform_11(%arg0: i32) -> (i32, i32, i32) {
    %c0_i32 = arith.constant 0 : i32
    %c0_i32_0 = arith.constant 0 : i32
    %c0_i32_1 = arith.constant 0 : i32
    return %arg0, %c0_i32, %c0_i32_0 : i32, i32, i32
  }
}

module attributes {stable_mosaic.version = 11 : i64} {
  func.func @_mha_ln_kernel(%arg0: i32, %arg1: memref<1x8x32xf32, #tpu.memory_space<vmem>>, %arg2: memref<1x10x32xf32, #tpu.memory_space<vmem>>, %arg3: memref<8x10xf32, #tpu.memory_space<vmem>>, %arg4: memref<32x32xbf16, #tpu.memory_space<vmem>>, %arg5: memref<32x64xbf16, #tpu.memory_space<vmem>>, %arg6: memref<32x32xbf16, #tpu.memory_space<vmem>>, %arg7: memref<1x32xf32, #tpu.memory_space<vmem>>, %arg8: memref<1x64xf32, #tpu.memory_space<vmem>>, %arg9: memref<1x32xf32, #tpu.memory_space<vmem>>, %arg10: memref<1x32xf32, #tpu.memory_space<vmem>>, %arg11: memref<1x32xf32, #tpu.memory_space<vmem>>, %arg12: memref<1x8x32xf32, #tpu.memory_space<vmem>>) attributes {dimension_semantics = [#tpu.dimension_semantics<parallel>], iteration_bounds = array<i64: 2>, scalar_prefetch = 0 : i64, scratch_operands = 0 : i64, tpu.core_type = #tpu.core_type<tc>, window_params = [{transform_indices = @transform_0, window_bounds = array<i64: 1, 8, 32>}, {transform_indices = @transform_1, window_bounds = array<i64: 1, 10, 32>}, {pipeline_mode = #tpu.pipeline_mode<synchronous>, transform_indices = @transform_2, window_bounds = array<i64: 8, 10>}, {pipeline_mode = #tpu.pipeline_mode<synchronous>, transform_indices = @transform_3, window_bounds = array<i64: 32, 32>}, {pipeline_mode = #tpu.pipeline_mode<synchronous>, transform_indices = @transform_4, window_bounds = array<i64: 32, 64>}, {pipeline_mode = #tpu.pipeline_mode<synchronous>, transform_indices = @transform_5, window_bounds = array<i64: 32, 32>}, {pipeline_mode = #tpu.pipeline_mode<synchronous>, transform_indices = @transform_6, window_bounds = array<i64: 1, 32>}, {pipeline_mode = #tpu.pipeline_mode<synchronous>, transform_indices = @transform_7, window_bounds = array<i64: 1, 64>}, {pipeline_mode = #tpu.pipeline_mode<synchronous>, transform_indices = @transform_8, window_bounds = array<i64: 1, 32>}, {pipeline_mode = #tpu.pipeline_mode<synchronous>, transform_indices = @transform_9, window_bounds = array<i64: 1, 32>}, {pipeline_mode = #tpu.pipeline_mode<synchronous>, transform_indices = @transform_10, window_bounds = array<i64: 1, 32>}, {transform_indices = @transform_11, window_bounds = array<i64: 1, 8, 32>}]} {
    %c0 = arith.constant 0 : index
    %c0_0 = arith.constant 0 : index
    %c0_1 = arith.constant 0 : index
    %0 = vector.load %arg1[%c0, %c0_0, %c0_1] : memref<1x8x32xf32, #tpu.memory_space<vmem>>, vector<1x8x32xf32>
    %1 = vector.shape_cast %0 : vector<1x8x32xf32> to vector<8x32xf32>
    %c0_2 = arith.constant 0 : index
    %c0_3 = arith.constant 0 : index
    %c0_4 = arith.constant 0 : index
    %2 = vector.load %arg2[%c0_2, %c0_3, %c0_4] : memref<1x10x32xf32, #tpu.memory_space<vmem>>, vector<1x10x32xf32>
    %3 = vector.shape_cast %2 : vector<1x10x32xf32> to vector<10x32xf32>
    %4 = arith.truncf %1 : vector<8x32xf32> to vector<8x32xbf16>
    %c0_5 = arith.constant 0 : index
    %c0_6 = arith.constant 0 : index
    %5 = vector.load %arg4[%c0_5, %c0_6] : memref<32x32xbf16, #tpu.memory_space<vmem>>, vector<32x32xbf16>
    %cst = arith.constant dense<0.000000e+00> : vector<8x32xf32>
    %6 = tpu.matmul %4, %5, %cst {dimension_numbers = #tpu.dot_dimension_numbers<[1], [0], [0], [1], [0, 0, 1, 1], [], []>} : vector<8x32xbf16>, vector<32x32xbf16>, vector<8x32xf32> -> vector<8x32xf32>
    %c0_7 = arith.constant 0 : index
    %c0_8 = arith.constant 0 : index
    %7 = vector.load %arg7[%c0_7, %c0_8] : memref<1x32xf32, #tpu.memory_space<vmem>>, vector<1x32xf32>
    %8 = vector.broadcast %7 : vector<1x32xf32> to vector<8x32xf32>
    %9 = arith.addf %6, %8 : vector<8x32xf32>
    %10 = arith.truncf %3 : vector<10x32xf32> to vector<10x32xbf16>
    %c0_9 = arith.constant 0 : index
    %c0_10 = arith.constant 0 : index
    %11 = vector.load %arg5[%c0_9, %c0_10] : memref<32x64xbf16, #tpu.memory_space<vmem>>, vector<32x64xbf16>
    %cst_11 = arith.constant dense<0.000000e+00> : vector<10x64xf32>
    %12 = tpu.matmul %10, %11, %cst_11 {dimension_numbers = #tpu.dot_dimension_numbers<[1], [0], [0], [1], [0, 0, 1, 1], [], []>} : vector<10x32xbf16>, vector<32x64xbf16>, vector<10x64xf32> -> vector<10x64xf32>
    %c0_12 = arith.constant 0 : index
    %c0_13 = arith.constant 0 : index
    %13 = vector.load %arg8[%c0_12, %c0_13] : memref<1x64xf32, #tpu.memory_space<vmem>>, vector<1x64xf32>
    %14 = vector.broadcast %13 : vector<1x64xf32> to vector<10x64xf32>
    %15 = arith.addf %12, %14 : vector<10x64xf32>
    %16 = vector.extract_strided_slice %15 {offsets = [0, 0], sizes = [10, 32], strides = [1, 1]} : vector<10x64xf32> to vector<10x32xf32>
    %17 = vector.extract_strided_slice %15 {offsets = [0, 32], sizes = [10, 32], strides = [1, 1]} : vector<10x64xf32> to vector<10x32xf32>
    %c0_14 = arith.constant 0 : index
    %c0_15 = arith.constant 0 : index
    %18 = vector.load %arg3[%c0_14, %c0_15] : memref<8x10xf32, #tpu.memory_space<vmem>>, vector<8x10xf32>
    %19 = arith.truncf %9 : vector<8x32xf32> to vector<8x32xbf16>
    %20 = arith.truncf %16 : vector<10x32xf32> to vector<10x32xbf16>
    %21 = arith.truncf %17 : vector<10x32xf32> to vector<10x32xbf16>
    %22 = vector.extract_strided_slice %19 {offsets = [0, 0], sizes = [8, 8], strides = [1, 1]} : vector<8x32xbf16> to vector<8x8xbf16>
    %23 = vector.extract_strided_slice %20 {offsets = [0, 0], sizes = [10, 8], strides = [1, 1]} : vector<10x32xbf16> to vector<10x8xbf16>
    %24 = vector.extract_strided_slice %21 {offsets = [0, 0], sizes = [10, 8], strides = [1, 1]} : vector<10x32xbf16> to vector<10x8xbf16>
    %cst_16 = arith.constant dense<0.000000e+00> : vector<8x10xf32>
    %25 = tpu.matmul %22, %23, %cst_16 {dimension_numbers = #tpu.dot_dimension_numbers<[1], [1], [0], [0], [0, 0, 1, 0], [], []>} : vector<8x8xbf16>, vector<10x8xbf16>, vector<8x10xf32> -> vector<8x10xf32>
    %cst_17 = arith.constant 0.353553385 : f32
    %26 = vector.broadcast %cst_17 : f32 to vector<8x10xf32>
    %27 = arith.mulf %25, %26 : vector<8x10xf32>
    %28 = arith.addf %27, %18 : vector<8x10xf32>
    %cst_18 = arith.constant dense<0xFF800000> : vector<8xf32>
    %29 = vector.multi_reduction <maximumf>, %28, %cst_18 [1] : vector<8x10xf32> to vector<8xf32>
    %30 = vector.shape_cast %29 : vector<8xf32> to vector<8x1xf32>
    %31 = vector.broadcast %30 : vector<8x1xf32> to vector<8x10xf32>
    %32 = arith.subf %28, %31 : vector<8x10xf32>
    %33 = math.exp %32 : vector<8x10xf32>
    %cst_19 = arith.constant dense<0.000000e+00> : vector<8xf32>
    %34 = vector.multi_reduction <add>, %33, %cst_19 [1] : vector<8x10xf32> to vector<8xf32>
    %35 = vector.shape_cast %34 : vector<8xf32> to vector<8x1xf32>
    %36 = tpu.reciprocal %35 {approx = true} : vector<8x1xf32> -> vector<8x1xf32>
    %37 = vector.broadcast %36 : vector<8x1xf32> to vector<8x10xf32>
    %38 = arith.mulf %33, %37 : vector<8x10xf32>
    %39 = arith.truncf %38 : vector<8x10xf32> to vector<8x10xbf16>
    %cst_20 = arith.constant dense<0.000000e+00> : vector<8x8xf32>
    %40 = tpu.matmul %39, %24, %cst_20 {dimension_numbers = #tpu.dot_dimension_numbers<[1], [0], [0], [1], [0, 0, 1, 1], [], []>} : vector<8x10xbf16>, vector<10x8xbf16>, vector<8x8xf32> -> vector<8x8xf32>
    %41 = vector.extract_strided_slice %19 {offsets = [0, 8], sizes = [8, 8], strides = [1, 1]} : vector<8x32xbf16> to vector<8x8xbf16>
    %42 = vector.extract_strided_slice %20 {offsets = [0, 8], sizes = [10, 8], strides = [1, 1]} : vector<10x32xbf16> to vector<10x8xbf16>
    %43 = vector.extract_strided_slice %21 {offsets = [0, 8], sizes = [10, 8], strides = [1, 1]} : vector<10x32xbf16> to vector<10x8xbf16>
    %cst_21 = arith.constant dense<0.000000e+00> : vector<8x10xf32>
    %44 = tpu.matmul %41, %42, %cst_21 {dimension_numbers = #tpu.dot_dimension_numbers<[1], [1], [0], [0], [0, 0, 1, 0], [], []>} : vector<8x8xbf16>, vector<10x8xbf16>, vector<8x10xf32> -> vector<8x10xf32>
    %cst_22 = arith.constant 0.353553385 : f32
    %45 = vector.broadcast %cst_22 : f32 to vector<8x10xf32>
    %46 = arith.mulf %44, %45 : vector<8x10xf32>
    %47 = arith.addf %46, %18 : vector<8x10xf32>
    %cst_23 = arith.constant dense<0xFF800000> : vector<8xf32>
    %48 = vector.multi_reduction <maximumf>, %47, %cst_23 [1] : vector<8x10xf32> to vector<8xf32>
    %49 = vector.shape_cast %48 : vector<8xf32> to vector<8x1xf32>
    %50 = vector.broadcast %49 : vector<8x1xf32> to vector<8x10xf32>
    %51 = arith.subf %47, %50 : vector<8x10xf32>
    %52 = math.exp %51 : vector<8x10xf32>
    %cst_24 = arith.constant dense<0.000000e+00> : vector<8xf32>
    %53 = vector.multi_reduction <add>, %52, %cst_24 [1] : vector<8x10xf32> to vector<8xf32>
    %54 = vector.shape_cast %53 : vector<8xf32> to vector<8x1xf32>
    %55 = tpu.reciprocal %54 {approx = true} : vector<8x1xf32> -> vector<8x1xf32>
    %56 = vector.broadcast %55 : vector<8x1xf32> to vector<8x10xf32>
    %57 = arith.mulf %52, %56 : vector<8x10xf32>
    %58 = arith.truncf %57 : vector<8x10xf32> to vector<8x10xbf16>
    %cst_25 = arith.constant dense<0.000000e+00> : vector<8x8xf32>
    %59 = tpu.matmul %58, %43, %cst_25 {dimension_numbers = #tpu.dot_dimension_numbers<[1], [0], [0], [1], [0, 0, 1, 1], [], []>} : vector<8x10xbf16>, vector<10x8xbf16>, vector<8x8xf32> -> vector<8x8xf32>
    %60 = vector.extract_strided_slice %19 {offsets = [0, 16], sizes = [8, 8], strides = [1, 1]} : vector<8x32xbf16> to vector<8x8xbf16>
    %61 = vector.extract_strided_slice %20 {offsets = [0, 16], sizes = [10, 8], strides = [1, 1]} : vector<10x32xbf16> to vector<10x8xbf16>
    %62 = vector.extract_strided_slice %21 {offsets = [0, 16], sizes = [10, 8], strides = [1, 1]} : vector<10x32xbf16> to vector<10x8xbf16>
    %cst_26 = arith.constant dense<0.000000e+00> : vector<8x10xf32>
    %63 = tpu.matmul %60, %61, %cst_26 {dimension_numbers = #tpu.dot_dimension_numbers<[1], [1], [0], [0], [0, 0, 1, 0], [], []>} : vector<8x8xbf16>, vector<10x8xbf16>, vector<8x10xf32> -> vector<8x10xf32>
    %cst_27 = arith.constant 0.353553385 : f32
    %64 = vector.broadcast %cst_27 : f32 to vector<8x10xf32>
    %65 = arith.mulf %63, %64 : vector<8x10xf32>
    %66 = arith.addf %65, %18 : vector<8x10xf32>
    %cst_28 = arith.constant dense<0xFF800000> : vector<8xf32>
    %67 = vector.multi_reduction <maximumf>, %66, %cst_28 [1] : vector<8x10xf32> to vector<8xf32>
    %68 = vector.shape_cast %67 : vector<8xf32> to vector<8x1xf32>
    %69 = vector.broadcast %68 : vector<8x1xf32> to vector<8x10xf32>
    %70 = arith.subf %66, %69 : vector<8x10xf32>
    %71 = math.exp %70 : vector<8x10xf32>
    %cst_29 = arith.constant dense<0.000000e+00> : vector<8xf32>
    %72 = vector.multi_reduction <add>, %71, %cst_29 [1] : vector<8x10xf32> to vector<8xf32>
    %73 = vector.shape_cast %72 : vector<8xf32> to vector<8x1xf32>
    %74 = tpu.reciprocal %73 {approx = true} : vector<8x1xf32> -> vector<8x1xf32>
    %75 = vector.broadcast %74 : vector<8x1xf32> to vector<8x10xf32>
    %76 = arith.mulf %71, %75 : vector<8x10xf32>
    %77 = arith.truncf %76 : vector<8x10xf32> to vector<8x10xbf16>
    %cst_30 = arith.constant dense<0.000000e+00> : vector<8x8xf32>
    %78 = tpu.matmul %77, %62, %cst_30 {dimension_numbers = #tpu.dot_dimension_numbers<[1], [0], [0], [1], [0, 0, 1, 1], [], []>} : vector<8x10xbf16>, vector<10x8xbf16>, vector<8x8xf32> -> vector<8x8xf32>
    %79 = vector.extract_strided_slice %19 {offsets = [0, 24], sizes = [8, 8], strides = [1, 1]} : vector<8x32xbf16> to vector<8x8xbf16>
    %80 = vector.extract_strided_slice %20 {offsets = [0, 24], sizes = [10, 8], strides = [1, 1]} : vector<10x32xbf16> to vector<10x8xbf16>
    %81 = vector.extract_strided_slice %21 {offsets = [0, 24], sizes = [10, 8], strides = [1, 1]} : vector<10x32xbf16> to vector<10x8xbf16>
    %cst_31 = arith.constant dense<0.000000e+00> : vector<8x10xf32>
    %82 = tpu.matmul %79, %80, %cst_31 {dimension_numbers = #tpu.dot_dimension_numbers<[1], [1], [0], [0], [0, 0, 1, 0], [], []>} : vector<8x8xbf16>, vector<10x8xbf16>, vector<8x10xf32> -> vector<8x10xf32>
    %cst_32 = arith.constant 0.353553385 : f32
    %83 = vector.broadcast %cst_32 : f32 to vector<8x10xf32>
    %84 = arith.mulf %82, %83 : vector<8x10xf32>
    %85 = arith.addf %84, %18 : vector<8x10xf32>
    %cst_33 = arith.constant dense<0xFF800000> : vector<8xf32>
    %86 = vector.multi_reduction <maximumf>, %85, %cst_33 [1] : vector<8x10xf32> to vector<8xf32>
    %87 = vector.shape_cast %86 : vector<8xf32> to vector<8x1xf32>
    %88 = vector.broadcast %87 : vector<8x1xf32> to vector<8x10xf32>
    %89 = arith.subf %85, %88 : vector<8x10xf32>
    %90 = math.exp %89 : vector<8x10xf32>
    %cst_34 = arith.constant dense<0.000000e+00> : vector<8xf32>
    %91 = vector.multi_reduction <add>, %90, %cst_34 [1] : vector<8x10xf32> to vector<8xf32>
    %92 = vector.shape_cast %91 : vector<8xf32> to vector<8x1xf32>
    %93 = tpu.reciprocal %92 {approx = true} : vector<8x1xf32> -> vector<8x1xf32>
    %94 = vector.broadcast %93 : vector<8x1xf32> to vector<8x10xf32>
    %95 = arith.mulf %90, %94 : vector<8x10xf32>
    %96 = arith.truncf %95 : vector<8x10xf32> to vector<8x10xbf16>
    %cst_35 = arith.constant dense<0.000000e+00> : vector<8x8xf32>
    %97 = tpu.matmul %96, %81, %cst_35 {dimension_numbers = #tpu.dot_dimension_numbers<[1], [0], [0], [1], [0, 0, 1, 1], [], []>} : vector<8x10xbf16>, vector<10x8xbf16>, vector<8x8xf32> -> vector<8x8xf32>
    %98 = tpu.concatenate %40, %59, %78, %97 in 1 : vector<8x8xf32>, vector<8x8xf32>, vector<8x8xf32>, vector<8x8xf32> -> vector<8x32xf32>
    %99 = arith.truncf %98 : vector<8x32xf32> to vector<8x32xbf16>
    %c0_36 = arith.constant 0 : index
    %c0_37 = arith.constant 0 : index
    %100 = vector.load %arg6[%c0_36, %c0_37] : memref<32x32xbf16, #tpu.memory_space<vmem>>, vector<32x32xbf16>
    %cst_38 = arith.constant dense<0.000000e+00> : vector<8x32xf32>
    %101 = tpu.matmul %99, %100, %cst_38 {dimension_numbers = #tpu.dot_dimension_numbers<[1], [0], [0], [1], [0, 0, 1, 1], [], []>} : vector<8x32xbf16>, vector<32x32xbf16>, vector<8x32xf32> -> vector<8x32xf32>
    %c0_39 = arith.constant 0 : index
    %c0_40 = arith.constant 0 : index
    %102 = vector.load %arg9[%c0_39, %c0_40] : memref<1x32xf32, #tpu.memory_space<vmem>>, vector<1x32xf32>
    %103 = vector.broadcast %102 : vector<1x32xf32> to vector<8x32xf32>
    %104 = arith.addf %101, %103 : vector<8x32xf32>
    %105 = arith.addf %1, %104 : vector<8x32xf32>
    %cst_41 = arith.constant dense<0.000000e+00> : vector<8xf32>
    %106 = vector.multi_reduction <add>, %105, %cst_41 [1] : vector<8x32xf32> to vector<8xf32>
    %107 = vector.shape_cast %106 : vector<8xf32> to vector<8x1xf32>
    %cst_42 = arith.constant 3.200000e+01 : f32
    %108 = vector.broadcast %cst_42 : f32 to vector<8x1xf32>
    %109 = arith.divf %107, %108 : vector<8x1xf32>
    %110 = vector.broadcast %109 : vector<8x1xf32> to vector<8x32xf32>
    %111 = arith.subf %105, %110 : vector<8x32xf32>
    %112 = arith.mulf %111, %111 : vector<8x32xf32>
    %cst_43 = arith.constant dense<0.000000e+00> : vector<8xf32>
    %113 = vector.multi_reduction <add>, %112, %cst_43 [1] : vector<8x32xf32> to vector<8xf32>
    %114 = vector.shape_cast %113 : vector<8xf32> to vector<8x1xf32>
    %cst_44 = arith.constant 3.200000e+01 : f32
    %115 = vector.broadcast %cst_44 : f32 to vector<8x1xf32>
    %116 = arith.divf %114, %115 : vector<8x1xf32>
    %cst_45 = arith.constant 9.99999974E-6 : f32
    %117 = vector.broadcast %cst_45 : f32 to vector<8x1xf32>
    %118 = arith.addf %116, %117 : vector<8x1xf32>
    %119 = math.rsqrt %118 : vector<8x1xf32>
    %120 = vector.broadcast %119 : vector<8x1xf32> to vector<8x32xf32>
    %121 = arith.mulf %111, %120 : vector<8x32xf32>
    %c0_46 = arith.constant 0 : index
    %c0_47 = arith.constant 0 : index
    %122 = vector.load %arg10[%c0_46, %c0_47] : memref<1x32xf32, #tpu.memory_space<vmem>>, vector<1x32xf32>
    %123 = vector.broadcast %122 : vector<1x32xf32> to vector<8x32xf32>
    %124 = arith.mulf %121, %123 : vector<8x32xf32>
    %c0_48 = arith.constant 0 : index
    %c0_49 = arith.constant 0 : index
    %125 = vector.load %arg11[%c0_48, %c0_49] : memref<1x32xf32, #tpu.memory_space<vmem>>, vector<1x32xf32>
    %126 = vector.broadcast %125 : vector<1x32xf32> to vector<8x32xf32>
    %127 = arith.addf %124, %126 : vector<8x32xf32>
    %c0_50 = arith.constant 0 : index
    %c0_51 = arith.constant 0 : index
    %c0_52 = arith.constant 0 : index
    %128 = vector.load %arg12[%c0_50, %c0_51, %c0_52] : memref<1x8x32xf32, #tpu.memory_space<vmem>>, vector<1x8x32xf32>
    %129 = vector.shape_cast %128 : vector<1x8x32xf32> to vector<8x32xf32>
    %130 = vector.shape_cast %127 : vector<8x32xf32> to vector<1x8x32xf32>
    tpu.vector_store %arg12[%c0_50, %c0_51, %c0_52], %130 {strides = array<i32>} : memref<1x8x32xf32, #tpu.memory_space<vmem>>, vector<1x8x32xf32>,
    return
  }
  func.func @transform_0(%arg0: i32) -> (i32, i32, i32) {
    %c0_i32 = arith.constant 0 : i32
    %c0_i32_0 = arith.constant 0 : i32
    %c0_i32_1 = arith.constant 0 : i32
    return %arg0, %c0_i32, %c0_i32_0 : i32, i32, i32
  }
  func.func @transform_1(%arg0: i32) -> (i32, i32, i32) {
    %c0_i32 = arith.constant 0 : i32
    %c0_i32_0 = arith.constant 0 : i32
    %c0_i32_1 = arith.constant 0 : i32
    return %arg0, %c0_i32, %c0_i32_0 : i32, i32, i32
  }
  func.func @transform_2(%arg0: i32) -> (i32, i32) {
    %c0_i32 = arith.constant 0 : i32
    %c0_i32_0 = arith.constant 0 : i32
    %c0_i32_1 = arith.constant 0 : i32
    return %c0_i32, %c0_i32_0 : i32, i32
  }
  func.func @transform_3(%arg0: i32) -> (i32, i32) {
    %c0_i32 = arith.constant 0 : i32
    %c0_i32_0 = arith.constant 0 : i32
    %c0_i32_1 = arith.constant 0 : i32
    return %c0_i32, %c0_i32_0 : i32, i32
  }
  func.func @transform_4(%arg0: i32) -> (i32, i32) {
    %c0_i32 = arith.constant 0 : i32
    %c0_i32_0 = arith.constant 0 : i32
    %c0_i32_1 = arith.constant 0 : i32
    return %c0_i32, %c0_i32_0 : i32, i32
  }
  func.func @transform_5(%arg0: i32) -> (i32, i32) {
    %c0_i32 = arith.constant 0 : i32
    %c0_i32_0 = arith.constant 0 : i32
    %c0_i32_1 = arith.constant 0 : i32
    return %c0_i32, %c0_i32_0 : i32, i32
  }
  func.func @transform_6(%arg0: i32) -> (i32, i32) {
    %c0_i32 = arith.constant 0 : i32
    %c0_i32_0 = arith.constant 0 : i32
    %c0_i32_1 = arith.constant 0 : i32
    return %c0_i32, %c0_i32_0 : i32, i32
  }
  func.func @transform_7(%arg0: i32) -> (i32, i32) {
    %c0_i32 = arith.constant 0 : i32
    %c0_i32_0 = arith.constant 0 : i32
    %c0_i32_1 = arith.constant 0 : i32
    return %c0_i32, %c0_i32_0 : i32, i32
  }
  func.func @transform_8(%arg0: i32) -> (i32, i32) {
    %c0_i32 = arith.constant 0 : i32
    %c0_i32_0 = arith.constant 0 : i32
    %c0_i32_1 = arith.constant 0 : i32
    return %c0_i32, %c0_i32_0 : i32, i32
  }
  func.func @transform_9(%arg0: i32) -> (i32, i32) {
    %c0_i32 = arith.constant 0 : i32
    %c0_i32_0 = arith.constant 0 : i32
    %c0_i32_1 = arith.constant 0 : i32
    return %c0_i32, %c0_i32_0 : i32, i32
  }
  func.func @transform_10(%arg0: i32) -> (i32, i32) {
    %c0_i32 = arith.constant 0 : i32
    %c0_i32_0 = arith.constant 0 : i32
    %c0_i32_1 = arith.constant 0 : i32
    return %c0_i32, %c0_i32_0 : i32, i32
  }
  func.func @transform_11(%arg0: i32) -> (i32, i32, i32) {
    %c0_i32 = arith.constant 0 : i32
    %c0_i32_0 = arith.constant 0 : i32
    %c0_i32_1 = arith.constant 0 : i32
    return %arg0, %c0_i32, %c0_i32_0 : i32, i32, i32
  }
}

module attributes {stable_mosaic.version = 11 : i64} {
  func.func @_ffn_ln_kernel(%arg0: i32, %arg1: memref<16x32xf32, #tpu.memory_space<vmem>>, %arg2: memref<32x64xbf16, #tpu.memory_space<vmem>>, %arg3: memref<1x64xf32, #tpu.memory_space<vmem>>, %arg4: memref<64x32xbf16, #tpu.memory_space<vmem>>, %arg5: memref<1x32xf32, #tpu.memory_space<vmem>>, %arg6: memref<1x32xf32, #tpu.memory_space<vmem>>, %arg7: memref<1x32xf32, #tpu.memory_space<vmem>>, %arg8: memref<16x32xf32, #tpu.memory_space<vmem>>) attributes {dimension_semantics = [#tpu.dimension_semantics<parallel>], iteration_bounds = array<i64: 1>, scalar_prefetch = 0 : i64, scratch_operands = 0 : i64, tpu.core_type = #tpu.core_type<tc>, window_params = [{transform_indices = @transform_0, window_bounds = array<i64: 16, 32>}, {pipeline_mode = #tpu.pipeline_mode<synchronous>, transform_indices = @transform_1, window_bounds = array<i64: 32, 64>}, {pipeline_mode = #tpu.pipeline_mode<synchronous>, transform_indices = @transform_2, window_bounds = array<i64: 1, 64>}, {pipeline_mode = #tpu.pipeline_mode<synchronous>, transform_indices = @transform_3, window_bounds = array<i64: 64, 32>}, {pipeline_mode = #tpu.pipeline_mode<synchronous>, transform_indices = @transform_4, window_bounds = array<i64: 1, 32>}, {pipeline_mode = #tpu.pipeline_mode<synchronous>, transform_indices = @transform_5, window_bounds = array<i64: 1, 32>}, {pipeline_mode = #tpu.pipeline_mode<synchronous>, transform_indices = @transform_6, window_bounds = array<i64: 1, 32>}, {transform_indices = @transform_7, window_bounds = array<i64: 16, 32>}]} {
    %c0 = arith.constant 0 : index
    %c0_0 = arith.constant 0 : index
    %0 = vector.load %arg1[%c0, %c0_0] : memref<16x32xf32, #tpu.memory_space<vmem>>, vector<16x32xf32>
    %1 = arith.truncf %0 : vector<16x32xf32> to vector<16x32xbf16>
    %c0_1 = arith.constant 0 : index
    %c0_2 = arith.constant 0 : index
    %2 = vector.load %arg2[%c0_1, %c0_2] : memref<32x64xbf16, #tpu.memory_space<vmem>>, vector<32x64xbf16>
    %cst = arith.constant dense<0.000000e+00> : vector<16x64xf32>
    %3 = tpu.matmul %1, %2, %cst {dimension_numbers = #tpu.dot_dimension_numbers<[1], [0], [0], [1], [0, 0, 1, 1], [], []>} : vector<16x32xbf16>, vector<32x64xbf16>, vector<16x64xf32> -> vector<16x64xf32>
    %c0_3 = arith.constant 0 : index
    %c0_4 = arith.constant 0 : index
    %4 = vector.load %arg3[%c0_3, %c0_4] : memref<1x64xf32, #tpu.memory_space<vmem>>, vector<1x64xf32>
    %5 = vector.broadcast %4 : vector<1x64xf32> to vector<16x64xf32>
    %6 = arith.addf %3, %5 : vector<16x64xf32>
    %cst_5 = arith.constant 0.000000e+00 : f32
    %7 = vector.broadcast %cst_5 : f32 to vector<16x64xf32>
    %8 = arith.maximumf %6, %7 : vector<16x64xf32>
    %9 = arith.truncf %8 : vector<16x64xf32> to vector<16x64xbf16>
    %c0_6 = arith.constant 0 : index
    %c0_7 = arith.constant 0 : index
    %10 = vector.load %arg4[%c0_6, %c0_7] : memref<64x32xbf16, #tpu.memory_space<vmem>>, vector<64x32xbf16>
    %cst_8 = arith.constant dense<0.000000e+00> : vector<16x32xf32>
    %11 = tpu.matmul %9, %10, %cst_8 {dimension_numbers = #tpu.dot_dimension_numbers<[1], [0], [0], [1], [0, 0, 1, 1], [], []>} : vector<16x64xbf16>, vector<64x32xbf16>, vector<16x32xf32> -> vector<16x32xf32>
    %c0_9 = arith.constant 0 : index
    %c0_10 = arith.constant 0 : index
    %12 = vector.load %arg5[%c0_9, %c0_10] : memref<1x32xf32, #tpu.memory_space<vmem>>, vector<1x32xf32>
    %13 = vector.broadcast %12 : vector<1x32xf32> to vector<16x32xf32>
    %14 = arith.addf %11, %13 : vector<16x32xf32>
    %15 = arith.addf %0, %14 : vector<16x32xf32>
    %cst_11 = arith.constant dense<0.000000e+00> : vector<16xf32>
    %16 = vector.multi_reduction <add>, %15, %cst_11 [1] : vector<16x32xf32> to vector<16xf32>
    %17 = vector.shape_cast %16 : vector<16xf32> to vector<16x1xf32>
    %cst_12 = arith.constant 3.200000e+01 : f32
    %18 = vector.broadcast %cst_12 : f32 to vector<16x1xf32>
    %19 = arith.divf %17, %18 : vector<16x1xf32>
    %20 = vector.broadcast %19 : vector<16x1xf32> to vector<16x32xf32>
    %21 = arith.subf %15, %20 : vector<16x32xf32>
    %22 = arith.mulf %21, %21 : vector<16x32xf32>
    %cst_13 = arith.constant dense<0.000000e+00> : vector<16xf32>
    %23 = vector.multi_reduction <add>, %22, %cst_13 [1] : vector<16x32xf32> to vector<16xf32>
    %24 = vector.shape_cast %23 : vector<16xf32> to vector<16x1xf32>
    %cst_14 = arith.constant 3.200000e+01 : f32
    %25 = vector.broadcast %cst_14 : f32 to vector<16x1xf32>
    %26 = arith.divf %24, %25 : vector<16x1xf32>
    %cst_15 = arith.constant 9.99999974E-6 : f32
    %27 = vector.broadcast %cst_15 : f32 to vector<16x1xf32>
    %28 = arith.addf %26, %27 : vector<16x1xf32>
    %29 = math.rsqrt %28 : vector<16x1xf32>
    %30 = vector.broadcast %29 : vector<16x1xf32> to vector<16x32xf32>
    %31 = arith.mulf %21, %30 : vector<16x32xf32>
    %c0_16 = arith.constant 0 : index
    %c0_17 = arith.constant 0 : index
    %32 = vector.load %arg6[%c0_16, %c0_17] : memref<1x32xf32, #tpu.memory_space<vmem>>, vector<1x32xf32>
    %33 = vector.broadcast %32 : vector<1x32xf32> to vector<16x32xf32>
    %34 = arith.mulf %31, %33 : vector<16x32xf32>
    %c0_18 = arith.constant 0 : index
    %c0_19 = arith.constant 0 : index
    %35 = vector.load %arg7[%c0_18, %c0_19] : memref<1x32xf32, #tpu.memory_space<vmem>>, vector<1x32xf32>
    %36 = vector.broadcast %35 : vector<1x32xf32> to vector<16x32xf32>
    %37 = arith.addf %34, %36 : vector<16x32xf32>
    %c0_20 = arith.constant 0 : index
    %c0_21 = arith.constant 0 : index
    %38 = vector.load %arg8[%c0_20, %c0_21] : memref<16x32xf32, #tpu.memory_space<vmem>>, vector<16x32xf32>
    tpu.vector_store %arg8[%c0_20, %c0_21], %37 {strides = array<i32>} : memref<16x32xf32, #tpu.memory_space<vmem>>, vector<16x32xf32>,
    return
  }
  func.func @transform_0(%arg0: i32) -> (i32, i32) {
    %c0_i32 = arith.constant 0 : i32
    %c0_i32_0 = arith.constant 0 : i32
    return %arg0, %c0_i32 : i32, i32
  }
  func.func @transform_1(%arg0: i32) -> (i32, i32) {
    %c0_i32 = arith.constant 0 : i32
    %c0_i32_0 = arith.constant 0 : i32
    %c0_i32_1 = arith.constant 0 : i32
    return %c0_i32, %c0_i32_0 : i32, i32
  }
  func.func @transform_2(%arg0: i32) -> (i32, i32) {
    %c0_i32 = arith.constant 0 : i32
    %c0_i32_0 = arith.constant 0 : i32
    %c0_i32_1 = arith.constant 0 : i32
    return %c0_i32, %c0_i32_0 : i32, i32
  }
  func.func @transform_3(%arg0: i32) -> (i32, i32) {
    %c0_i32 = arith.constant 0 : i32
    %c0_i32_0 = arith.constant 0 : i32
    %c0_i32_1 = arith.constant 0 : i32
    return %c0_i32, %c0_i32_0 : i32, i32
  }
  func.func @transform_4(%arg0: i32) -> (i32, i32) {
    %c0_i32 = arith.constant 0 : i32
    %c0_i32_0 = arith.constant 0 : i32
    %c0_i32_1 = arith.constant 0 : i32
    return %c0_i32, %c0_i32_0 : i32, i32
  }
  func.func @transform_5(%arg0: i32) -> (i32, i32) {
    %c0_i32 = arith.constant 0 : i32
    %c0_i32_0 = arith.constant 0 : i32
    %c0_i32_1 = arith.constant 0 : i32
    return %c0_i32, %c0_i32_0 : i32, i32
  }
  func.func @transform_6(%arg0: i32) -> (i32, i32) {
    %c0_i32 = arith.constant 0 : i32
    %c0_i32_0 = arith.constant 0 : i32
    %c0_i32_1 = arith.constant 0 : i32
    return %c0_i32, %c0_i32_0 : i32, i32
  }
  func.func @transform_7(%arg0: i32) -> (i32, i32) {
    %c0_i32 = arith.constant 0 : i32
    %c0_i32_0 = arith.constant 0 : i32
    return %arg0, %c0_i32 : i32, i32
  }
}

module attributes {stable_mosaic.version = 11 : i64} {
  func.func @_linear_kernel(%arg0: i32, %arg1: i32, %arg2: i32, %arg3: memref<16x32xf32, #tpu.memory_space<vmem>>, %arg4: memref<32x50xbf16, #tpu.memory_space<vmem>>, %arg5: memref<1x50xf32, #tpu.memory_space<vmem>>, %arg6: memref<16x50xf32, #tpu.memory_space<vmem>>, %arg7: memref<16x50xf32, #tpu.memory_space<vmem>>) attributes {dimension_semantics = [#tpu.dimension_semantics<parallel>, #tpu.dimension_semantics<parallel>, #tpu.dimension_semantics<arbitrary>], iteration_bounds = array<i64: 1, 1, 1>, scalar_prefetch = 0 : i64, scratch_operands = 1 : i64, tpu.core_type = #tpu.core_type<tc>, window_params = [{transform_indices = @transform_0, window_bounds = array<i64: 16, 32>}, {transform_indices = @transform_1, window_bounds = array<i64: 32, 50>}, {transform_indices = @transform_2, window_bounds = array<i64: 1, 50>}, {transform_indices = @transform_3, window_bounds = array<i64: 16, 50>}]} {
    %c0_i32 = arith.constant 0 : i32
    %0 = arith.cmpi eq, %arg2, %c0_i32 : i32
    %1 = arith.extui %0 : i1 to i32
    %c0_i32_0 = arith.constant 0 : i32
    %2 = arith.cmpi ne, %1, %c0_i32_0 : i32
    scf.if %2 {
      %cst_10 = arith.constant 0.000000e+00 : f32
      %13 = vector.broadcast %cst_10 : f32 to vector<16x50xf32>
      %c0_11 = arith.constant 0 : index
      %c0_12 = arith.constant 0 : index
      %14 = vector.load %arg7[%c0_11, %c0_12] : memref<16x50xf32, #tpu.memory_space<vmem>>, vector<16x50xf32>
      tpu.vector_store %arg7[%c0_11, %c0_12], %13 {strides = array<i32>} : memref<16x50xf32, #tpu.memory_space<vmem>>, vector<16x50xf32>,
    } else {
    }
    %c0 = arith.constant 0 : index
    %c0_1 = arith.constant 0 : index
    %3 = vector.load %arg7[%c0, %c0_1] : memref<16x50xf32, #tpu.memory_space<vmem>>, vector<16x50xf32>
    %c0_2 = arith.constant 0 : index
    %c0_3 = arith.constant 0 : index
    %4 = vector.load %arg3[%c0_2, %c0_3] : memref<16x32xf32, #tpu.memory_space<vmem>>, vector<16x32xf32>
    %5 = arith.truncf %4 : vector<16x32xf32> to vector<16x32xbf16>
    %c0_4 = arith.constant 0 : index
    %c0_5 = arith.constant 0 : index
    %6 = vector.load %arg4[%c0_4, %c0_5] : memref<32x50xbf16, #tpu.memory_space<vmem>>, vector<32x50xbf16>
    %cst = arith.constant dense<0.000000e+00> : vector<16x50xf32>
    %7 = tpu.matmul %5, %6, %cst {dimension_numbers = #tpu.dot_dimension_numbers<[1], [0], [0], [1], [0, 0, 1, 1], [], []>} : vector<16x32xbf16>, vector<32x50xbf16>, vector<16x50xf32> -> vector<16x50xf32>
    %8 = arith.addf %3, %7 : vector<16x50xf32>
    %c0_6 = arith.constant 0 : index
    %c0_7 = arith.constant 0 : index
    %9 = vector.load %arg7[%c0_6, %c0_7] : memref<16x50xf32, #tpu.memory_space<vmem>>, vector<16x50xf32>
    tpu.vector_store %arg7[%c0_6, %c0_7], %8 {strides = array<i32>} : memref<16x50xf32, #tpu.memory_space<vmem>>, vector<16x50xf32>,
    %c0_i32_8 = arith.constant 0 : i32
    %10 = arith.cmpi eq, %arg2, %c0_i32_8 : i32
    %11 = arith.extui %10 : i1 to i32
    %c0_i32_9 = arith.constant 0 : i32
    %12 = arith.cmpi ne, %11, %c0_i32_9 : i32
    scf.if %12 {
      %c0_10 = arith.constant 0 : index
      %c0_11 = arith.constant 0 : index
      %13 = vector.load %arg7[%c0_10, %c0_11] : memref<16x50xf32, #tpu.memory_space<vmem>>, vector<16x50xf32>
      %c0_12 = arith.constant 0 : index
      %c0_13 = arith.constant 0 : index
      %14 = vector.load %arg5[%c0_12, %c0_13] : memref<1x50xf32, #tpu.memory_space<vmem>>, vector<1x50xf32>
      %15 = vector.broadcast %14 : vector<1x50xf32> to vector<16x50xf32>
      %16 = arith.addf %13, %15 : vector<16x50xf32>
      %c0_14 = arith.constant 0 : index
      %c0_15 = arith.constant 0 : index
      %17 = vector.load %arg6[%c0_14, %c0_15] : memref<16x50xf32, #tpu.memory_space<vmem>>, vector<16x50xf32>
      tpu.vector_store %arg6[%c0_14, %c0_15], %16 {strides = array<i32>} : memref<16x50xf32, #tpu.memory_space<vmem>>, vector<16x50xf32>,
    } else {
    }
    return
  }
  func.func @transform_0(%arg0: i32, %arg1: i32, %arg2: i32) -> (i32, i32) {
    %c0_i32 = arith.constant 0 : i32
    return %arg0, %arg2 : i32, i32
  }
  func.func @transform_1(%arg0: i32, %arg1: i32, %arg2: i32) -> (i32, i32) {
    %c0_i32 = arith.constant 0 : i32
    return %arg2, %arg1 : i32, i32
  }
  func.func @transform_2(%arg0: i32, %arg1: i32, %arg2: i32) -> (i32, i32) {
    %c0_i32 = arith.constant 0 : i32
    %c0_i32_0 = arith.constant 0 : i32
    return %c0_i32, %arg1 : i32, i32
  }
  func.func @transform_3(%arg0: i32, %arg1: i32, %arg2: i32) -> (i32, i32) {
    %c0_i32 = arith.constant 0 : i32
    return %arg0, %arg1 : i32, i32
  }
}

</mosaic_0001>

<bundles_post_ra>
// kernel: transformer_decoder_forward.8
= control target key start
LH: loop header
LB: loop body
LE: loop exit
PB: predicated region body
PF: predicated region fallthrough
CT: control target
= control target key end

     0   :  { %s1061_s17 = smov 0   ;;  %s1176_s0 = inlined_call_operand.vmem [shape: f32[2,8,32], index: 0, kind: input, shape index: {}]   ;;  %s1177_s1 = inlined_call_operand.vmem [shape: f32[2,10,32], index: 1, kind: input, shape index: {}]   ;;  %s1178_s2 = inlined_call_operand.vmem [shape: f32[8,10], index: 2, kind: input, shape index: {}]   ;;  %s1179_s3 = inlined_call_operand.vmem [shape: bf16[32,32], index: 3, kind: input, shape index: {}]   ;;  %s1180_s4 = inlined_call_operand.vmem [shape: bf16[32,64], index: 4, kind: input, shape index: {}]   ;;  %s1181_s5 = inlined_call_operand.vmem [shape: bf16[32,32], index: 5, kind: input, shape index: {}]   ;;  %s1182_s6 = inlined_call_operand.vmem [shape: f32[1,32], index: 6, kind: input, shape index: {}]   ;;  %s1183_s7 = inlined_call_operand.vmem [shape: f32[1,64], index: 7, kind: input, shape index: {}]   ;;  %s1184_s8 = inlined_call_operand.vmem [shape: f32[1,32], index: 8, kind: input, shape index: {}]   ;;  %s1185_s9 = inlined_call_operand.vmem [shape: f32[1,32], index: 9, kind: input, shape index: {}]   ;;  %s1186_s10 = inlined_call_operand.vmem [shape: f32[1,32], index: 10, kind: input, shape index: {}]   ;;  %s1187_s11 = inlined_call_operand.vmem [shape: f32[2,8,32], index: 11, kind: output, shape index: {}]  }
   0x1 LB: > { %s885_s18 = sadd.s32 4294967295, %s988_s17   ;;  %p889_p0 = scmp.ge.s32.totalorder %s988_s17, 1  ;;  %s988_s17 = sphi %s1061_s17, %s21_s17  }
   0x2   : > { %p346_p1 = scmp.lt.s32.totalorder %s988_s17, 3 }
   0x4   : > { %p347_p2 = pnand %p889_p0, %p346_p1 }
   0x5   : > { %p389_p3 = scmp.lt.s32.totalorder (!%p347_p2), %s885_s18, 1  ;;  %s990_s22 = smov (!%p347_p2), 120  }
   0x6   : > { %350 = sbr.rel (%p347_p2) target bundleno = 1622 (0x656), region = 64  ;;  %s991_s23 = smov (!%p347_p2), 96  }
   0x7   : > { %s992_s24 = smov (!%p347_p2), 112   ;;  %s993_s25 = smov (!%p347_p2), 104  }
   0x8   : > { %s994_s29 = smov (!%p347_p2), 88   ;;  %s995_s30 = smov (!%p347_p2), 80  }
   0x9   : > { %s997_s13 = smov (!%p347_p2), 8   ;;  %s998_s14 = smov (!%p347_p2), 16  }
   0xb   : > { %v933_v0 = vld [vmem:[%s1179_s3 + $0x8] sm:$0xff]  ;;  %v932_v2 = vld [vmem:[%s1179_s3] sm:$0xff]  ;;  %s1189_s18 = smov (!%p389_p3, %s885_s18), 1  ;;  %vm427_vm0 = vcmask 261120   ;;  %vm491_vm1 = vcmask 64512   ;;  %vm531_vm2 = vcmask 1044480  }
   0xc   : > { %v935_v1 = vld [vmem:[%s1180_s4 + $0x8] sm:$0xff]  ;;  %437 = vmatpush.bf16.msra.mxu0 %v933_v0  ;;  %v934_v3 = vld [vmem:[%s1180_s4] sm:$0xff]  ;;  %s890_s27 = sshll.u32 %s1189_s18, 3  ;;  %s931_s28 = sshll.u32 %s1189_s18, 4  ;;  %vm513_vm3 = vcmask 80896   ;;  %vm738_vm4 = vcmask 130048  }
   0xd   : > { %474 = vmatpush.bf16.msra.mxu1 %v935_v1  ;;  %s392_s12 = scalar_lea.vmem %s1176_s0, %s890_s27  ;;  %s397_s15 = scalar_lea.vmem %s1177_s1, %s931_s28  ;;  %v957_v9 = vld [vmem:[%s1182_s6] ss:$0 sm:$0xff]  ;;  %vm740_vm5 = vcmask 195584  }
   0xe   : > { %v1090_v4 = vld [vmem:[%s392_s12] sm:$0xff]  ;;  %v405_v7 = vld [vmem:[%s397_s15 + $0x8] sm:$0x3]  ;;  %s996_s12 = smov 72  }
   0xf   : > { %v406_v5 = vpack.c.bf16 %v1090_v4, %v1090_v4  ;;  %v404_v6 = vld [vmem:[%s397_s15] sm:$0xff]  ;;  %s999_s15 = smov 24  }
  0x10   : > { %438 = vmatpush.bf16.msra.mxu0 %v932_v2  ;;  %v444_v8 = vpack.c.bf16 %v405_v7, %v404_v6  ;;  %v958_v13 = vld [vmem:[%s1183_s7] ss:$0 sm:$0xff] }
  0x11   : > { %475 = vmatpush.bf16.msra.mxu1 %v934_v3  ;;  %v482_v36 = vld [vmem:[%s1178_s2] sm:$0xff] }
  0x13   : > { %902 = vmatmul.msk.bf16.vlgmr.msra.gmra.mxu0 %vm427_vm0, %v406_v5 }
  0x14   : > { %911 = vmatmul.msk.bf16.vlgmr.msra.gmra.mxu1 %vm427_vm0, %v444_v8 }
  0x90   : > { %v440_v10 = vpop.f32.mrf.mxu0 }
  0x91   : > { %v441_v11 = vadd.f32 %v957_v9, %v440_v10  ;;  %v477_v12 = vpop.f32.mrf.mxu1 }
  0x92   : > { %v478_v16 = vadd.f32 %v958_v13, %v477_v12 }
  0x93   : > { %v483_v14 = vpack.c.bf16 %v441_v11, %v441_v11 }
  0x94   : > { %v484_v20 = vpack.c.bf16 %v478_v16, %v478_v16 }
  0x95   : > { %v549_v15 = vunpack.c.l.b16 %v483_v14 }
  0x96   : > { %v488_v23 = vunpack.c.l.b16 %v484_v20 }
  0x97   : > { %v550_v17 = vpack.c.b16 %v549_v15, %v549_v15 }
  0x98   : > { %v442_v18 = vpop.f32.mrf.mxu0 }
  0x99   : > { %v479_v19 = vpop.f32.mrf.mxu1  ;;  %551 = vrot.lane.b32.xlu2 %v550_v17, %s990_s22 }
  0x9a   : > { %v480_v21 = vadd.f32 %v958_v13, %v479_v19 }
  0x9c   : > { %v485_v22 = vpack.c.bf16 %v480_v21, %v480_v21 }
  0x9e   : > { %v489_v24 = vunpack.c.l.b16 %v485_v22 }
  0xa0   : > { %v1105_v25 = vpack.c.b16 %v489_v24, %v488_v23 }
  0xa2   : > { %526 = vrot.lane.b32.xlu1 %v1105_v25, %s991_s23  ;;  %611 = vrot.lane.b32.xlu2 %v1105_v25, %s992_s24  ;;  %v496_v26 = vsel %vm491_vm1, %v1105_v25, 0 }
  0xa3   : > { %505 = vmatpush.bf16.xpose.msra.mxu2 %v496_v26 }
  0xaa   : > { %553 = vrot.lane.b32.xlu1 %v1105_v25, %s990_s22  ;;  %912 = vmatmul.msk.bf16.vlgmr.msra.gmra.mxu2 %vm491_vm1, %v483_v14 }
  0xab   : > { %667 = vrot.lane.b32.xlu2 %v550_v17, %s993_s25 }
  0xb2   : > { %609 = vrot.lane.b32.xlu1 %v550_v17, %s992_s24 }
  0xf3   : > { %v552_v27 = vpop.permute.xlu2 %551 }
  0xfc   : > { %v612_v28 = vpop.permute.xlu2 %611 }
  0xfd   : > { %v617_v29 = vsel %vm491_vm1, %v612_v28, 0 }
  0xfe   : > { %626 = vmatpush.bf16.xpose.msrb.mxu1 %v617_v29 }
 0x105   : > { %v668_v51 = vpop.permute.xlu2 %667 }
 0x114   : > { %v527_v30 = vpop.permute.xlu1 %526 }
 0x115   : > { %v533_v31 = vsel %vm531_vm2, %v527_v30, 0 }
 0x116   : > { %542 = vmatpush.bf16.msra.mxu3 %v533_v31 }
 0x11c   : > { %v554_v32 = vpop.permute.xlu1 %553 }
 0x11d   : > { %v559_v33 = vsel %vm491_vm1, %v554_v32, 0 }
 0x11e   : > { %568 = vmatpush.bf16.xpose.msrb.mxu3 %v559_v33 }
 0x124   : > { %v610_v34 = vpop.permute.xlu1 %609 }
 0x125   : > { %916 = vmatmul.msk.bf16.vlgmr.msrb.gmra.mxu1 %vm491_vm1, %v610_v34 }
 0x12d   : > { %v507_v35 = vpop.f32.mrf.mxu2 }
 0x12e   : > { %v511_v37 = vmul.f32 0.35355338, %v507_v35 }
 0x130   : > { %v512_v38 = vadd.f32 %v511_v37, %v482_v36 }
 0x132   : > { %v514_v39 = vsel %vm513_vm3, %v512_v38, -inf }
 0x133   : > { %515 = vmax.xlane.f32.xlu0 %v514_v39 }
 0x135   : > { %v509_v40 = vpop.f32.mrf.mxu2 }
 0x1a2   : > { %v628_v41 = vpop.f32.mrf.mxu1 }
 0x1a3   : > { %v632_v42 = vmul.f32 0.35355338, %v628_v41 }
 0x1a5   : > { %v633_v43 = vadd.f32 %v632_v42, %v482_v36 }
 0x1a6   : > { %v516_v44 = vpop.xlane.xlu0 %515 }
 0x1a7   : > { %v517_v45 = vsub.f32 %v512_v38, %v516_v44  ;;  %v634_v46 = vsel %vm513_vm3, %v633_v43, -inf }
 0x1a8   : > { %635 = vmax.xlane.f32.xlu2 %v634_v46  ;;  %v937_v46 = vld [vmem:[%s1181_s5 + $0x8] sm:$0xff] }
 0x1a9   : > { %v518_v47 = vmul.f32 1.442695, %v517_v45  ;;  %772 = vmatpush.bf16.msra.mxu1 %v937_v46 }
 0x1aa   : > { %v630_v48 = vpop.f32.mrf.mxu1 }
 0x1ab   : > { %962 = vpow2.f32 %v518_v47  ;;  %v936_v47 = vld [vmem:[%s1181_s5] sm:$0xff] }
 0x1ad   : > { %773 = vmatpush.bf16.msra.mxu1 %v936_v47 }
 0x1b1   : > { %v963_v49 = vpop.eup %962 }
 0x1b2   : > { %v520_v50 = vsel %vm513_vm3, %v963_v49, 0.0 }
 0x1b3   : > { %521 = vadd.xlane.f32.xlu0 %v520_v50 }
 0x1c7   : > { %669 = vrot.lane.b32.xlu0 %v1105_v25, %s993_s25 }
 0x21b   : > { %v636_v52 = vpop.xlane.xlu2 %635 }
 0x21c   : > { %v637_v53 = vsub.f32 %v633_v43, %v636_v52 }
 0x21e   : > { %v638_v54 = vmul.f32 1.442695, %v637_v53 }
 0x220   : > { %964 = vpow2.f32 %v638_v54 }
 0x226   : > { %v965_v55 = vpop.eup %964  ;;  %v522_v56 = vpop.xlane.xlu0 %521 }
 0x227   : > { %966 = vrcp.f32 %v522_v56  ;;  %v640_v57 = vsel %vm513_vm3, %v965_v55, 0.0 }
 0x228   : > { %641 = vadd.xlane.f32.xlu2 %v640_v57 }
 0x22d   : > { %v967_v58 = vpop.eup %966 }
 0x22e   : > { %v524_v59 = vmul.f32 %v967_v58, %v963_v49 }
 0x230   : > { %v525_v60 = vpack.c.bf16 %v524_v59, %v524_v59 }
 0x232   : > { %913 = vmatmul.msk.bf16.vlgmr.msra.gmra.mxu3 %vm513_vm3, %v525_v60 }
 0x239   : > { %v670_v61 = vpop.permute.xlu0 %669 }
 0x23a   : > { %v675_v62 = vsel %vm491_vm1, %v670_v61, 0  ;;  %v1000_v61 = vmov 32.0  }
 0x23b   : > { %684 = vmatpush.bf16.xpose.msra.mxu3 %v675_v62 }
 0x242   : > { %914 = vmatmul.msk.bf16.vlgmr.msrb.gmra.mxu3 %vm491_vm1, %v552_v27 }
 0x252   : > { %918 = vmatmul.msk.bf16.vlgmr.msra.gmra.mxu3 %vm491_vm1, %v668_v51 }
 0x29b   : > { %v642_v24 = vpop.xlane.xlu2 %641 }
 0x2b5   : > { %v1131_v63 = vpop.f32.mrf.mxu3 }
 0x2bd   : > { %v546_v0 = vpop.f32.mrf.mxu3 }
 0x2c5   : > { %v570_v1 = vpop.f32.mrf.mxu3 }
 0x2c6   : > { %v574_v2 = vmul.f32 0.35355338, %v570_v1 }
 0x2c8   : > { %v575_v3 = vadd.f32 %v574_v2, %v482_v36 }
 0x2ca   : > { %v576_v5 = vsel %vm513_vm3, %v575_v3, -inf }
 0x2cb   : > { %577 = vmax.xlane.f32.xlu1 %v576_v5 }
 0x2cd   : > { %v572_v6 = vpop.f32.mrf.mxu3 }
 0x2d5   : > { %v686_v7 = vpop.f32.mrf.mxu3 }
 0x2d6   : > { %v690_v8 = vmul.f32 0.35355338, %v686_v7 }
 0x2d8   : > { %v691_v9 = vadd.f32 %v690_v8, %v482_v36 }
 0x2da   : > { %v692_v10 = vsel %vm513_vm3, %v691_v9, -inf }
 0x2db   : > { %693 = vmax.xlane.f32.xlu0 %v692_v10 }
 0x2dd   : > { %v688_v11 = vpop.f32.mrf.mxu3 }
 0x2e4   : > { %588 = vrot.lane.b32.xlu1 %v1105_v25, %s994_s29 }
 0x33e   : > { %v578_v12 = vpop.xlane.xlu1 %577 }
 0x33f   : > { %v579_v13 = vsub.f32 %v575_v3, %v578_v12 }
 0x341   : > { %v580_v14 = vmul.f32 1.442695, %v579_v13 }
 0x343   : > { %968 = vpow2.f32 %v580_v14 }
 0x349   : > { %v969_v15 = vpop.eup %968 }
 0x34a   : > { %v582_v16 = vsel %vm513_vm3, %v969_v15, 0.0 }
 0x34b   : > { %583 = vadd.xlane.f32.xlu2 %v582_v16 }
 0x34e   : > { %v694_v17 = vpop.xlane.xlu0 %693 }
 0x34f   : > { %v695_v18 = vsub.f32 %v691_v9, %v694_v17 }
 0x351   : > { %v696_v19 = vmul.f32 1.442695, %v695_v18  ;;  %v960_v18 = vld [vmem:[%s1185_s9] ss:$0 sm:$0xff] }
 0x353   : > { %970 = vpow2.f32 %v696_v19 }
 0x354   : > { %972 = vrcp.f32 %v642_v24 }
 0x356   : > { %v589_v20 = vpop.permute.xlu1 %588 }
 0x357   : > { %v594_v21 = vsel %vm531_vm2, %v589_v20, 0  ;;  %v961_v20 = vld [vmem:[%s1186_s10] ss:$0 sm:$0xff] }
 0x358   : > { %603 = vmatpush.bf16.msrb.mxu0 %v594_v21 }
 0x359   : > { %v971_v22 = vpop.eup %970 }
 0x35a   : > { %v698_v23 = vsel %vm513_vm3, %v971_v22, 0.0  ;;  %v973_v27 = vpop.eup %972 }
 0x35b   : > { %699 = vadd.xlane.f32.xlu0 %v698_v23  ;;  %v644_v29 = vmul.f32 %v973_v27, %v965_v55  ;;  %v959_v55 = vld [vmem:[%s1184_s8] ss:$0 sm:$0xff] }
 0x35d   : > { %v645_v34 = vpack.c.bf16 %v644_v29, %v644_v29 }
 0x363   : > { %646 = vrot.lane.b32.xlu2 %v1105_v25, %s995_s30 }
 0x36f   : > { %704 = vrot.lane.b32.xlu0 %v1105_v25, %s996_s12  ;;  %s401_s12 = scalar_lea.vmem %s1187_s11, %s890_s27 }
 0x3be   : > { %v584_v26 = vpop.xlane.xlu2 %583 }
 0x3bf   : > { %974 = vrcp.f32 %v584_v26 }
 0x3c5   : > { %v975_v28 = vpop.eup %974 }
 0x3c6   : > { %v586_v30 = vmul.f32 %v975_v28, %v969_v15  ;;  %v647_v31 = vpop.permute.xlu2 %646 }
 0x3c7   : > { %v652_v32 = vsel %vm531_vm2, %v647_v31, 0 }
 0x3c8   : > { %661 = vmatpush.bf16.msrb.mxu2 %v652_v32  ;;  %v587_v33 = vpack.c.bf16 %v586_v30, %v586_v30 }
 0x3ca   : > { %915 = vmatmul.msk.bf16.vlgmr.msrb.gmra.mxu0 %vm513_vm3, %v587_v33 }
 0x3cb   : > { %917 = vmatmul.msk.bf16.vlgmr.msrb.gmra.mxu2 %vm513_vm3, %v645_v34 }
 0x3ce   : > { %v700_v35 = vpop.xlane.xlu0 %699 }
 0x3cf   : > { %976 = vrcp.f32 %v700_v35 }
 0x3d0   : > { %978 = vrcp.f32 %v1000_v61 }
 0x3d5   : > { %v977_v25 = vpop.eup %976 }
 0x3d6   : > { %v702_v36 = vmul.f32 %v977_v25, %v971_v22  ;;  %v979_v62 = vpop.eup %978 }
 0x3d7   : > { %vm788_vm6 = vweird.f32 %v979_v62 }
 0x3d8   : > { %v703_v39 = vpack.c.bf16 %v702_v36, %v702_v36 }
 0x3e1   : > { %v705_v37 = vpop.permute.xlu0 %704 }
 0x3e2   : > { %v710_v38 = vsel %vm531_vm2, %v705_v37, 0 }
 0x3e3   : > { %719 = vmatpush.bf16.msra.mxu0 %v710_v38 }
 0x3e6   : > { %919 = vmatmul.msk.bf16.vlgmr.msra.gmra.mxu0 %vm513_vm3, %v703_v39 }
 0x447   : > { %v605_v40 = vpop.f32.mrf.mxu0 }
 0x448   : > { %726 = vrot.lane.b32.xlu1 %v605_v40, %s997_s13 }
 0x44e   : > { %v663_v41 = vpop.f32.mrf.mxu2 }
 0x44f   : > { %v607_v42 = vpop.f32.mrf.mxu0 }
 0x450   : > { %730 = vrot.lane.b32.xlu1 %v663_v41, %s998_s14 }
 0x456   : > { %v665_v43 = vpop.f32.mrf.mxu2 }
 0x463   : > { %v721_v44 = vpop.f32.mrf.mxu0 }
 0x464   : > { %734 = vrot.lane.b32.xlu2 %v721_v44, %s999_s15 }
 0x46b   : > { %v723_v45 = vpop.f32.mrf.mxu0 }
 0x4ba   : > { %v727_v48 = vpop.permute.xlu1 %726 }
 0x4bb   : > { %v737_v49 = vsel %vm491_vm1, %v1131_v63, %v727_v48  ;;  %v784_v63 = vmul.f32 32.0, %v979_v62 }
 0x4bd   : > { %v785_v0 = vsub.f32 1.0, %v784_v63 }
 0x4be   : > { %v735_v51 = vpop.permute.xlu2 %734 }
 0x4bf   : > { %v786_v1 = vmul.f32 %v979_v62, %v785_v0 }
 0x4c1   : > { %v787_v2 = vadd.f32 %v979_v62, %v786_v1 }
 0x4c2   : > { %v731_v50 = vpop.permute.xlu1 %730 }
 0x4c3   : > { %v739_v52 = vsel %vm738_vm4, %v737_v49, %v731_v50  ;;  %v789_v3 = vsel %vm788_vm6, %v979_v62, %v787_v2 }
 0x4c4   : > { %v741_v53 = vsel %vm740_vm5, %v739_v52, %v735_v51 }
 0x4c5   : > { %v742_v54 = vpack.c.bf16 %v741_v53, %v741_v53 }
 0x4c7   : > { %928 = vmatmul.msk.bf16.vlgmr.msra.gmra.mxu1 %vm427_vm0, %v742_v54 }
 0x544   : > { %v775_v56 = vpop.f32.mrf.mxu1 }
 0x545   : > { %v776_v57 = vadd.f32 %v959_v55, %v775_v56 }
 0x547   : > { %v779_v58 = vadd.f32 %v776_v57, %v1090_v4 }
 0x549   : > { %v780_v59 = vsel %vm427_vm0, %v779_v58, 0.0 }
 0x54a   : > { %781 = vadd.xlane.f32.xlu0 %v780_v59 }
 0x54c   : > { %v777_v60 = vpop.f32.mrf.mxu1 }
 0x5bd   : > { %v782_v5 = vpop.xlane.xlu0 %781 }
 0x5be   : > { %v790_v6 = vmul.f32 %v789_v3, %v782_v5 }
 0x5c0   : > { %v791_v7 = vsub.f32 %v779_v58, %v790_v6 }
 0x5c2   : > { %v792_v8 = vmul.f32 %v791_v7, %v791_v7 }
 0x5c4   : > { %v793_v9 = vsel %vm427_vm0, %v792_v8, 0.0 }
 0x5c5   : > { %794 = vadd.xlane.f32.xlu1 %v793_v9 }
 0x638   : > { %v795_v4 = vpop.xlane.xlu1 %794 }
 0x639   : > { %v796_v10 = vmul.f32 %v795_v4, %v789_v3 }
 0x63b   : > { %v797_v11 = vadd.f32 1e-05, %v796_v10 }
 0x63d   : > { %980 = vrsqrt.f32 %v797_v11  ;;  %vm804_vm8 = vweird.f32 %v797_v11 }
 0x643   : > { %v981_v12 = vpop.eup %980 }
 0x644   : > { %v799_v13 = vmul.f32 %v981_v12, %v797_v11  ;;  %vm805_vm7 = vweird.f32 %v981_v12 }
 0x645   : > { %vm806_vm9 = vmor %vm804_vm8, %vm805_vm7 }
 0x646   : > { %v800_v14 = vmul.f32 %v981_v12, %v799_v13 }
 0x648   : > { %v801_v15 = vmul.f32 0.5, %v800_v14 }
 0x64a   : > { %v802_v16 = vsub.f32 1.5, %v801_v15 }
 0x64c   : > { %v803_v17 = vmul.f32 %v981_v12, %v802_v16 }
 0x64e   : > { %v807_v19 = vsel %vm806_vm9, %v981_v12, %v803_v17 }
 0x64f   : > { %v808_v21 = vmul.f32 %v807_v19, %v791_v7 }
 0x651   : > { %v813_v22 = vmul.f32 %v960_v18, %v808_v21 }
 0x653   : > { %v818_v23 = vadd.f32 %v961_v20, %v813_v22 }
 0x655   : > { %819 = vst.msk [vmem:[%s401_s12] sm:$0xff] %vm427_vm0, %v818_v23 }
 0x656 PF: > { %s21_s17 = sadd.s32 1, %s988_s17  }
 0x657   : > { %p18_p4 = scmp.ge.s32.totalorder %s21_s17, 4  }
 0x659   :  { %20 = sbr.rel (!%p18_p4) target bundleno = 1 (0x1), region = 97 }

// kernel: transformer_decoder_forward.7
= control target key start
LH: loop header
LB: loop body
LE: loop exit
PB: predicated region body
PF: predicated region fallthrough
CT: control target
= control target key end

     0   :  { %s1050_s17 = smov 0   ;;  %s1161_s0 = inlined_call_operand.vmem [shape: f32[2,8,32], index: 0, kind: input, shape index: {}, may-alias: {0,1}]   ;;  %s1162_s1 = inlined_call_operand.vmem [shape: f32[2,8,32], index: 1, kind: input, shape index: {}, may-alias: {0,1}]   ;;  %s1163_s2 = inlined_call_operand.vmem [shape: f32[8,8], index: 2, kind: input, shape index: {}]   ;;  %s1164_s3 = inlined_call_operand.vmem [shape: bf16[32,32], index: 3, kind: input, shape index: {}]   ;;  %s1165_s4 = inlined_call_operand.vmem [shape: bf16[32,64], index: 4, kind: input, shape index: {}]   ;;  %s1166_s5 = inlined_call_operand.vmem [shape: bf16[32,32], index: 5, kind: input, shape index: {}]   ;;  %s1167_s6 = inlined_call_operand.vmem [shape: f32[1,32], index: 6, kind: input, shape index: {}]   ;;  %s1168_s7 = inlined_call_operand.vmem [shape: f32[1,64], index: 7, kind: input, shape index: {}]   ;;  %s1169_s8 = inlined_call_operand.vmem [shape: f32[1,32], index: 8, kind: input, shape index: {}]   ;;  %s1170_s9 = inlined_call_operand.vmem [shape: f32[1,32], index: 9, kind: input, shape index: {}]   ;;  %s1171_s10 = inlined_call_operand.vmem [shape: f32[1,32], index: 10, kind: input, shape index: {}]   ;;  %s1172_s11 = inlined_call_operand.vmem [shape: f32[2,8,32], index: 11, kind: output, shape index: {}]  }
   0x1 LB: > { %s876_s18 = sadd.s32 4294967295, %s977_s17   ;;  %p880_p0 = scmp.ge.s32.totalorder %s977_s17, 1  ;;  %s977_s17 = sphi %s1050_s17, %s21_s17  }
   0x2   : > { %p345_p1 = scmp.lt.s32.totalorder %s977_s17, 3 }
   0x4   : > { %p346_p2 = pnand %p880_p0, %p345_p1 }
   0x5   : > { %p387_p3 = scmp.lt.s32.totalorder (!%p346_p2), %s876_s18, 1  ;;  %s979_s20 = smov (!%p346_p2), 120  }
   0x6   : > { %349 = sbr.rel (%p346_p2) target bundleno = 1610 (0x64a), region = 64  ;;  %s980_s21 = smov (!%p346_p2), 96  }
   0x7   : > { %s981_s22 = smov (!%p346_p2), 112   ;;  %s982_s23 = smov (!%p346_p2), 104  }
   0x8   : > { %s983_s26 = smov (!%p346_p2), 88   ;;  %s984_s28 = smov (!%p346_p2), 80  }
   0x9   : > { %s985_s29 = smov (!%p346_p2), 72   ;;  %s987_s12 = smov (!%p346_p2), 16  }
   0xa   : > { %s988_s13 = smov (!%p346_p2), 24  }
   0xb   : > { %v922_v0 = vld [vmem:[%s1164_s3 + $0x8] sm:$0xff]  ;;  %v921_v2 = vld [vmem:[%s1164_s3] sm:$0xff]  ;;  %s1174_s18 = smov (!%p387_p3, %s876_s18), 1  ;;  %vm423_vm0 = vcmask 261120   ;;  %vm480_vm1 = vcmask 64512   ;;  %vm522_vm2 = vcmask 1043456  }
   0xc   : > { %v924_v1 = vld [vmem:[%s1165_s4 + $0x8] sm:$0xff]  ;;  %433 = vmatpush.bf16.msra.mxu0 %v922_v0  ;;  %v923_v3 = vld [vmem:[%s1165_s4] sm:$0xff]  ;;  %s1070_s27 = sshll.u32 %s1174_s18, 3  ;;  %vm729_vm3 = vcmask 130048   ;;  %vm731_vm4 = vcmask 195584  }
   0xd   : > { %470 = vmatpush.bf16.msra.mxu1 %v924_v1  ;;  %s390_s30 = scalar_lea.vmem %s1161_s0, %s1070_s27  ;;  %s394_s14 = scalar_lea.vmem %s1162_s1, %s1070_s27  ;;  %v946_v8 = vld [vmem:[%s1167_s6] ss:$0 sm:$0xff] }
   0xe   : > { %v1076_v4 = vld [vmem:[%s390_s30] sm:$0xff]  ;;  %s986_s30 = smov 8  }
   0xf   : > { %v402_v5 = vpack.c.bf16 %v1076_v4, %v1076_v4  ;;  %v401_v6 = vld [vmem:[%s394_s14] sm:$0xff] }
  0x10   : > { %434 = vmatpush.bf16.msra.mxu0 %v921_v2  ;;  %v440_v7 = vpack.c.bf16 %v401_v6, %v401_v6  ;;  %v947_v9 = vld [vmem:[%s1168_s7] ss:$0 sm:$0xff] }
  0x11   : > { %471 = vmatpush.bf16.msra.mxu1 %v923_v3  ;;  %v477_v32 = vld [vmem:[%s1163_s2] sm:$0xff] }
  0x13   : > { %892 = vmatmul.msk.bf16.vlgmr.msra.gmra.mxu0 %vm423_vm0, %v402_v5 }
  0x14   : > { %901 = vmatmul.msk.bf16.vlgmr.msra.gmra.mxu1 %vm423_vm0, %v440_v7 }
  0x90   : > { %v436_v10 = vpop.f32.mrf.mxu0 }
  0x91   : > { %v437_v11 = vadd.f32 %v946_v8, %v436_v10  ;;  %v473_v12 = vpop.f32.mrf.mxu1 }
  0x92   : > { %v474_v13 = vadd.f32 %v947_v9, %v473_v12 }
  0x93   : > { %v478_v14 = vpack.c.bf16 %v437_v11, %v437_v11 }
  0x94   : > { %v479_v15 = vpack.c.bf16 %v474_v13, %v474_v13 }
  0x95   : > { %v540_v16 = vunpack.c.l.b16 %v478_v14 }
  0x96   : > { %v515_v17 = vunpack.c.l.b16 %v479_v15  ;;  %v485_v18 = vsel %vm480_vm1, %v479_v15, 0 }
  0x97   : > { %v541_v19 = vpack.c.b16 %v540_v16, %v540_v16  ;;  %494 = vmatpush.bf16.xpose.msra.mxu2 %v485_v18 }
  0x98   : > { %v1093_v20 = vpack.c.b16 %v515_v17, %v515_v17  ;;  %v438_v21 = vpop.f32.mrf.mxu0 }
  0x99   : > { %v475_v22 = vpop.f32.mrf.mxu1  ;;  %542 = vrot.lane.b32.xlu2 %v541_v19, %s979_s20 }
  0x9a   : > { %517 = vrot.lane.b32.xlu1 %v1093_v20, %s980_s21 }
  0x9e   : > { %902 = vmatmul.msk.bf16.vlgmr.msra.gmra.mxu2 %vm480_vm1, %v478_v14 }
  0xa1   : > { %602 = vrot.lane.b32.xlu2 %v1093_v20, %s981_s22 }
  0xa2   : > { %544 = vrot.lane.b32.xlu1 %v1093_v20, %s979_s20 }
  0xa9   : > { %658 = vrot.lane.b32.xlu2 %v541_v19, %s982_s23 }
  0xaa   : > { %600 = vrot.lane.b32.xlu1 %v541_v19, %s981_s22 }
  0xf3   : > { %v543_v23 = vpop.permute.xlu2 %542 }
  0xfb   : > { %v603_v24 = vpop.permute.xlu2 %602 }
  0xfc   : > { %v608_v25 = vsel %vm480_vm1, %v603_v24, 0 }
  0xfd   : > { %617 = vmatpush.bf16.xpose.msrb.mxu1 %v608_v25 }
 0x103   : > { %v659_v47 = vpop.permute.xlu2 %658 }
 0x10c   : > { %v518_v26 = vpop.permute.xlu1 %517 }
 0x10d   : > { %v524_v27 = vsel %vm522_vm2, %v518_v26, 0 }
 0x10e   : > { %533 = vmatpush.bf16.msra.mxu3 %v524_v27 }
 0x114   : > { %v545_v28 = vpop.permute.xlu1 %544 }
 0x115   : > { %v550_v29 = vsel %vm480_vm1, %v545_v28, 0 }
 0x116   : > { %559 = vmatpush.bf16.xpose.msrb.mxu3 %v550_v29 }
 0x11c   : > { %v601_v30 = vpop.permute.xlu1 %600 }
 0x11d   : > { %906 = vmatmul.msk.bf16.vlgmr.msrb.gmra.mxu1 %vm480_vm1, %v601_v30 }
 0x121   : > { %v496_v31 = vpop.f32.mrf.mxu2 }
 0x122   : > { %v500_v33 = vmul.f32 0.35355338, %v496_v31 }
 0x124   : > { %v501_v34 = vadd.f32 %v500_v33, %v477_v32 }
 0x126   : > { %v502_v35 = vsel %vm480_vm1, %v501_v34, -inf }
 0x127   : > { %503 = vmax.xlane.f32.xlu0 %v502_v35 }
 0x129   : > { %v498_v36 = vpop.f32.mrf.mxu2 }
 0x19a   : > { %v619_v37 = vpop.f32.mrf.mxu1  ;;  %v504_v38 = vpop.xlane.xlu0 %503 }
 0x19b   : > { %v623_v39 = vmul.f32 0.35355338, %v619_v37  ;;  %v505_v40 = vsub.f32 %v501_v34, %v504_v38 }
 0x19d   : > { %v506_v41 = vmul.f32 1.442695, %v505_v40  ;;  %v624_v42 = vadd.f32 %v623_v39, %v477_v32 }
 0x19f   : > { %951 = vpow2.f32 %v506_v41  ;;  %v625_v43 = vsel %vm480_vm1, %v624_v42, -inf }
 0x1a0   : > { %626 = vmax.xlane.f32.xlu2 %v625_v43  ;;  %v925_v43 = vld [vmem:[%s1166_s5] sm:$0xff] }
 0x1a2   : > { %v621_v44 = vpop.f32.mrf.mxu1 }
 0x1a5   : > { %v952_v45 = vpop.eup %951 }
 0x1a6   : > { %v508_v46 = vsel %vm480_vm1, %v952_v45, 0.0 }
 0x1a7   : > { %509 = vadd.xlane.f32.xlu0 %v508_v46 }
 0x1bb   : > { %660 = vrot.lane.b32.xlu0 %v1093_v20, %s982_s23 }
 0x213   : > { %v627_v48 = vpop.xlane.xlu2 %626 }
 0x214   : > { %v628_v49 = vsub.f32 %v624_v42, %v627_v48  ;;  %v926_v42 = vld [vmem:[%s1166_s5 + $0x8] sm:$0xff] }
 0x215   : > { %763 = vmatpush.bf16.msra.mxu1 %v926_v42 }
 0x216   : > { %v629_v50 = vmul.f32 1.442695, %v628_v49 }
 0x218   : > { %953 = vpow2.f32 %v629_v50 }
 0x219   : > { %764 = vmatpush.bf16.msra.mxu1 %v925_v43 }
 0x21a   : > { %v510_v51 = vpop.xlane.xlu0 %509 }
 0x21b   : > { %955 = vrcp.f32 %v510_v51  ;;  %v948_v51 = vld [vmem:[%s1169_s8] ss:$0 sm:$0xff] }
 0x21e   : > { %v954_v52 = vpop.eup %953 }
 0x21f   : > { %v631_v53 = vsel %vm480_vm1, %v954_v52, 0.0 }
 0x220   : > { %632 = vadd.xlane.f32.xlu2 %v631_v53 }
 0x221   : > { %v956_v54 = vpop.eup %955 }
 0x222   : > { %v512_v55 = vmul.f32 %v956_v54, %v952_v45 }
 0x224   : > { %v513_v56 = vpack.c.bf16 %v512_v55, %v512_v55 }
 0x226   : > { %903 = vmatmul.msk.bf16.vlgmr.msra.gmra.mxu3 %vm480_vm1, %v513_v56 }
 0x22d   : > { %v661_v57 = vpop.permute.xlu0 %660 }
 0x22e   : > { %v666_v58 = vsel %vm480_vm1, %v661_v57, 0  ;;  %v989_v57 = vmov 32.0  }
 0x22f   : > { %675 = vmatpush.bf16.xpose.msra.mxu3 %v666_v58 }
 0x236   : > { %904 = vmatmul.msk.bf16.vlgmr.msrb.gmra.mxu3 %vm480_vm1, %v543_v23 }
 0x246   : > { %908 = vmatmul.msk.bf16.vlgmr.msra.gmra.mxu3 %vm480_vm1, %v659_v47 }
 0x293   : > { %v633_v21 = vpop.xlane.xlu2 %632 }
 0x2a9   : > { %v1117_v59 = vpop.f32.mrf.mxu3 }
 0x2b1   : > { %v537_v60 = vpop.f32.mrf.mxu3 }
 0x2b9   : > { %v561_v61 = vpop.f32.mrf.mxu3 }
 0x2ba   : > { %v565_v62 = vmul.f32 0.35355338, %v561_v61 }
 0x2bc   : > { %v566_v63 = vadd.f32 %v565_v62, %v477_v32 }
 0x2be   : > { %v567_v0 = vsel %vm480_vm1, %v566_v63, -inf }
 0x2bf   : > { %568 = vmax.xlane.f32.xlu1 %v567_v0 }
 0x2c1   : > { %v563_v1 = vpop.f32.mrf.mxu3 }
 0x2c9   : > { %v677_v2 = vpop.f32.mrf.mxu3 }
 0x2ca   : > { %v681_v3 = vmul.f32 0.35355338, %v677_v2 }
 0x2cc   : > { %v682_v5 = vadd.f32 %v681_v3, %v477_v32 }
 0x2ce   : > { %v683_v6 = vsel %vm480_vm1, %v682_v5, -inf }
 0x2cf   : > { %684 = vmax.xlane.f32.xlu0 %v683_v6 }
 0x2d1   : > { %v679_v7 = vpop.f32.mrf.mxu3 }
 0x2d8   : > { %579 = vrot.lane.b32.xlu1 %v1093_v20, %s983_s26 }
 0x332   : > { %v569_v8 = vpop.xlane.xlu1 %568 }
 0x333   : > { %v570_v9 = vsub.f32 %v566_v63, %v569_v8 }
 0x335   : > { %v571_v10 = vmul.f32 1.442695, %v570_v9 }
 0x337   : > { %957 = vpow2.f32 %v571_v10 }
 0x33d   : > { %v958_v11 = vpop.eup %957 }
 0x33e   : > { %v573_v12 = vsel %vm480_vm1, %v958_v11, 0.0 }
 0x33f   : > { %574 = vadd.xlane.f32.xlu2 %v573_v12 }
 0x342   : > { %v685_v13 = vpop.xlane.xlu0 %684 }
 0x343   : > { %v686_v14 = vsub.f32 %v682_v5, %v685_v13 }
 0x345   : > { %v687_v15 = vmul.f32 1.442695, %v686_v14  ;;  %v949_v14 = vld [vmem:[%s1170_s9] ss:$0 sm:$0xff] }
 0x347   : > { %959 = vpow2.f32 %v687_v15 }
 0x348   : > { %961 = vrcp.f32 %v633_v21 }
 0x34a   : > { %v580_v16 = vpop.permute.xlu1 %579 }
 0x34b   : > { %v585_v17 = vsel %vm522_vm2, %v580_v16, 0  ;;  %v950_v16 = vld [vmem:[%s1171_s10] ss:$0 sm:$0xff] }
 0x34c   : > { %594 = vmatpush.bf16.msrb.mxu0 %v585_v17 }
 0x34d   : > { %v960_v18 = vpop.eup %959 }
 0x34e   : > { %v689_v19 = vsel %vm480_vm1, %v960_v18, 0.0  ;;  %v962_v23 = vpop.eup %961 }
 0x34f   : > { %690 = vadd.xlane.f32.xlu0 %v689_v19  ;;  %v635_v25 = vmul.f32 %v962_v23, %v954_v52 }
 0x351   : > { %v636_v30 = vpack.c.bf16 %v635_v25, %v635_v25 }
 0x357   : > { %637 = vrot.lane.b32.xlu2 %v1093_v20, %s984_s28  ;;  %s398_s28 = scalar_lea.vmem %s1172_s11, %s1070_s27 }
 0x363   : > { %695 = vrot.lane.b32.xlu0 %v1093_v20, %s985_s29 }
 0x3b2   : > { %v575_v22 = vpop.xlane.xlu2 %574 }
 0x3b3   : > { %963 = vrcp.f32 %v575_v22 }
 0x3b9   : > { %v964_v24 = vpop.eup %963 }
 0x3ba   : > { %v577_v26 = vmul.f32 %v964_v24, %v958_v11  ;;  %v638_v27 = vpop.permute.xlu2 %637 }
 0x3bb   : > { %v643_v28 = vsel %vm522_vm2, %v638_v27, 0 }
 0x3bc   : > { %652 = vmatpush.bf16.msrb.mxu2 %v643_v28  ;;  %v578_v29 = vpack.c.bf16 %v577_v26, %v577_v26 }
 0x3be   : > { %905 = vmatmul.msk.bf16.vlgmr.msrb.gmra.mxu0 %vm480_vm1, %v578_v29 }
 0x3bf   : > { %907 = vmatmul.msk.bf16.vlgmr.msrb.gmra.mxu2 %vm480_vm1, %v636_v30 }
 0x3c2   : > { %v691_v31 = vpop.xlane.xlu0 %690 }
 0x3c3   : > { %965 = vrcp.f32 %v691_v31 }
 0x3c4   : > { %967 = vrcp.f32 %v989_v57 }
 0x3c9   : > { %v966_v20 = vpop.eup %965 }
 0x3ca   : > { %v693_v32 = vmul.f32 %v966_v20, %v960_v18  ;;  %v968_v58 = vpop.eup %967 }
 0x3cb   : > { %vm779_vm5 = vweird.f32 %v968_v58 }
 0x3cc   : > { %v694_v35 = vpack.c.bf16 %v693_v32, %v693_v32 }
 0x3d5   : > { %v696_v33 = vpop.permute.xlu0 %695 }
 0x3d6   : > { %v701_v34 = vsel %vm522_vm2, %v696_v33, 0 }
 0x3d7   : > { %710 = vmatpush.bf16.msra.mxu0 %v701_v34 }
 0x3da   : > { %909 = vmatmul.msk.bf16.vlgmr.msra.gmra.mxu0 %vm480_vm1, %v694_v35 }
 0x43b   : > { %v596_v36 = vpop.f32.mrf.mxu0 }
 0x43c   : > { %717 = vrot.lane.b32.xlu1 %v596_v36, %s986_s30 }
 0x442   : > { %v654_v37 = vpop.f32.mrf.mxu2 }
 0x443   : > { %v598_v38 = vpop.f32.mrf.mxu0 }
 0x444   : > { %721 = vrot.lane.b32.xlu1 %v654_v37, %s987_s12 }
 0x44a   : > { %v656_v39 = vpop.f32.mrf.mxu2 }
 0x457   : > { %v712_v40 = vpop.f32.mrf.mxu0 }
 0x458   : > { %725 = vrot.lane.b32.xlu2 %v712_v40, %s988_s13 }
 0x45f   : > { %v714_v41 = vpop.f32.mrf.mxu0 }
 0x4ae   : > { %v718_v44 = vpop.permute.xlu1 %717 }
 0x4af   : > { %v728_v45 = vsel %vm480_vm1, %v1117_v59, %v718_v44  ;;  %v775_v59 = vmul.f32 32.0, %v968_v58 }
 0x4b1   : > { %v776_v60 = vsub.f32 1.0, %v775_v59 }
 0x4b2   : > { %v726_v47 = vpop.permute.xlu2 %725 }
 0x4b3   : > { %v777_v61 = vmul.f32 %v968_v58, %v776_v60 }
 0x4b5   : > { %v778_v62 = vadd.f32 %v968_v58, %v777_v61 }
 0x4b6   : > { %v722_v46 = vpop.permute.xlu1 %721 }
 0x4b7   : > { %v730_v48 = vsel %vm729_vm3, %v728_v45, %v722_v46  ;;  %v780_v63 = vsel %vm779_vm5, %v968_v58, %v778_v62 }
 0x4b8   : > { %v732_v49 = vsel %vm731_vm4, %v730_v48, %v726_v47 }
 0x4b9   : > { %v733_v50 = vpack.c.bf16 %v732_v49, %v732_v49 }
 0x4bb   : > { %918 = vmatmul.msk.bf16.vlgmr.msra.gmra.mxu1 %vm423_vm0, %v733_v50 }
 0x538   : > { %v766_v52 = vpop.f32.mrf.mxu1 }
 0x539   : > { %v767_v53 = vadd.f32 %v948_v51, %v766_v52 }
 0x53b   : > { %v770_v54 = vadd.f32 %v767_v53, %v1076_v4 }
 0x53d   : > { %v771_v55 = vsel %vm423_vm0, %v770_v54, 0.0 }
 0x53e   : > { %772 = vadd.xlane.f32.xlu0 %v771_v55 }
 0x540   : > { %v768_v56 = vpop.f32.mrf.mxu1 }
 0x5b1   : > { %v773_v0 = vpop.xlane.xlu0 %772 }
 0x5b2   : > { %v781_v1 = vmul.f32 %v780_v63, %v773_v0 }
 0x5b4   : > { %v782_v2 = vsub.f32 %v770_v54, %v781_v1 }
 0x5b6   : > { %v783_v3 = vmul.f32 %v782_v2, %v782_v2 }
 0x5b8   : > { %v784_v5 = vsel %vm423_vm0, %v783_v3, 0.0 }
 0x5b9   : > { %785 = vadd.xlane.f32.xlu1 %v784_v5 }
 0x62c   : > { %v786_v4 = vpop.xlane.xlu1 %785 }
 0x62d   : > { %v787_v6 = vmul.f32 %v786_v4, %v780_v63 }
 0x62f   : > { %v788_v7 = vadd.f32 1e-05, %v787_v6 }
 0x631   : > { %969 = vrsqrt.f32 %v788_v7  ;;  %vm795_vm7 = vweird.f32 %v788_v7 }
 0x637   : > { %v970_v8 = vpop.eup %969 }
 0x638   : > { %v790_v9 = vmul.f32 %v970_v8, %v788_v7  ;;  %vm796_vm6 = vweird.f32 %v970_v8 }
 0x639   : > { %vm797_vm8 = vmor %vm795_vm7, %vm796_vm6 }
 0x63a   : > { %v791_v10 = vmul.f32 %v970_v8, %v790_v9 }
 0x63c   : > { %v792_v11 = vmul.f32 0.5, %v791_v10 }
 0x63e   : > { %v793_v12 = vsub.f32 1.5, %v792_v11 }
 0x640   : > { %v794_v13 = vmul.f32 %v970_v8, %v793_v12 }
 0x642   : > { %v798_v15 = vsel %vm797_vm8, %v970_v8, %v794_v13 }
 0x643   : > { %v799_v17 = vmul.f32 %v798_v15, %v782_v2 }
 0x645   : > { %v804_v18 = vmul.f32 %v949_v14, %v799_v17 }
 0x647   : > { %v809_v19 = vadd.f32 %v950_v16, %v804_v18 }
 0x649   : > { %810 = vst.msk [vmem:[%s398_s28] sm:$0xff] %vm423_vm0, %v809_v19 }
 0x64a PF: > { %s21_s17 = sadd.s32 1, %s977_s17  }
 0x64b   : > { %p18_p4 = scmp.ge.s32.totalorder %s21_s17, 4  }
 0x64d   :  { %20 = sbr.rel (!%p18_p4) target bundleno = 1 (0x1), region = 97 }

// kernel: transformer_decoder_forward.9
= control target key start
LH: loop header
LB: loop body
LE: loop exit
PB: predicated region body
PF: predicated region fallthrough
CT: control target
= control target key end

     0   :  { %vm50_vm0 = vcmask 261120   ;;  %vm107_vm1 = vcmask 523264   ;;  %v239_v26 = vmov 32.0   ;;  %s329_s1 = inlined_call_operand.vmem [shape: bf16[32,64], index: 1, kind: input, shape index: {}]   ;;  %s330_s0 = inlined_call_operand.vmem [shape: f32[16,32], index: 0, kind: input, shape index: {}]   ;;  %s331_s2 = inlined_call_operand.vmem [shape: f32[1,64], index: 2, kind: input, shape index: {}]   ;;  %s332_s4 = inlined_call_operand.vmem [shape: f32[1,32], index: 4, kind: input, shape index: {}]   ;;  %s333_s3 = inlined_call_operand.vmem [shape: bf16[64,32], index: 3, kind: input, shape index: {}]   ;;  %s334_s5 = inlined_call_operand.vmem [shape: f32[1,32], index: 5, kind: input, shape index: {}]   ;;  %s335_s6 = inlined_call_operand.vmem [shape: f32[1,32], index: 6, kind: input, shape index: {}]   ;;  %s336_s7 = inlined_call_operand.vmem [shape: f32[16,32], index: 7, kind: output, shape index: {}]  }
   0x1   :  { %v223_v0 = vld [vmem:[%s329_s1 + $0x8] sm:$0xff]  ;;  %v222_v1 = vld [vmem:[%s329_s1] sm:$0xff]  ;;  %v227_v5 = vld [vmem:[%s333_s3 + $0x18] sm:$0xff]  ;;  %233 = vrcp.f32 %v239_v26 }
   0x2   :  { %60 = vmatpush.bf16.msra.mxu0 %v223_v0  ;;  %v27_v2 = vld [vmem:[%s330_s0] sm:$0xff]  ;;  %v28_v3 = vld [vmem:[%s330_s0 + $0x8] sm:$0xff]  ;;  %115 = vmatpush.bf16.msra.mxu1 %v227_v5  ;;  %v226_v6 = vld [vmem:[%s333_s3 + $0x10] sm:$0xff] }
   0x3   :  { %v29_v4 = vpack.c.bf16 %v28_v3, %v27_v2  ;;  %v225_v7 = vld [vmem:[%s333_s3 + $0x8] sm:$0xff]  ;;  %v224_v8 = vld [vmem:[%s333_s3] sm:$0xff] }
   0x4   :  { %v229_v10 = vld [vmem:[%s331_s2] ss:$0 sm:$0xff] }
   0x5   :  { %v230_v17 = vld [vmem:[%s332_s4] ss:$0 sm:$0xff] }
   0x6   :  { %61 = vmatpush.bf16.msra.mxu0 %v222_v1  ;;  %116 = vmatpush.bf16.msra.mxu1 %v226_v6  ;;  %v231_v57 = vld [vmem:[%s334_s5] ss:$0 sm:$0xff] }
   0x7   :  { %v234_v27 = vpop.eup %233  ;;  %v232_v60 = vld [vmem:[%s335_s6] ss:$0 sm:$0xff] }
   0x8   :  { %v134_v28 = vmul.f32 32.0, %v234_v27  ;;  %vm138_vm2 = vweird.f32 %v234_v27 }
   0x9   :  { %204 = vmatmul.msk.bf16.vlgmr.msra.gmra.mxu0 %vm50_vm0, %v29_v4 }
   0xa   :  { %117 = vmatpush.bf16.msra.mxu1 %v225_v7  ;;  %v135_v29 = vsub.f32 1.0, %v134_v28 }
   0xc   :  { %v136_v30 = vmul.f32 %v234_v27, %v135_v29 }
   0xe   :  { %118 = vmatpush.bf16.msra.mxu1 %v224_v8  ;;  %v137_v31 = vadd.f32 %v234_v27, %v136_v30 }
  0x10   :  { %v139_v32 = vsel %vm138_vm2, %v234_v27, %v137_v31 }
  0x86   :  { %v63_v9 = vpop.f32.mrf.mxu0 }
  0x87   :  { %v64_v11 = vadd.f32 %v229_v10, %v63_v9 }
  0x89   :  { %v68_v14 = vmax.f32 %v64_v11, 0.0 }
  0x8e   :  { %v65_v12 = vpop.f32.mrf.mxu0 }
  0x8f   :  { %v66_v13 = vadd.f32 %v229_v10, %v65_v12 }
  0x91   :  { %v69_v15 = vmax.f32 %v66_v13, 0.0 }
  0x93   :  { %v70_v16 = vpack.c.bf16 %v69_v15, %v68_v14 }
  0x95   :  { %221 = vmatmul.msk.bf16.vlgmr.msra.gmra.mxu1 %vm107_vm1, %v70_v16 }
 0x112   :  { %v120_v18 = vpop.f32.mrf.mxu1 }
 0x113   :  { %v121_v19 = vadd.f32 %v230_v17, %v120_v18 }
 0x115   :  { %v125_v20 = vadd.f32 %v121_v19, %v27_v2 }
 0x117   :  { %v127_v21 = vsel %vm50_vm0, %v125_v20, 0.0 }
 0x118   :  { %128 = vadd.xlane.f32.xlu0 %v127_v21 }
 0x11a   :  { %v122_v22 = vpop.f32.mrf.mxu1 }
 0x11b   :  { %v123_v23 = vadd.f32 %v230_v17, %v122_v22 }
 0x11d   :  { %v126_v24 = vadd.f32 %v123_v23, %v28_v3 }
 0x11f   :  { %v130_v25 = vsel %vm50_vm0, %v126_v24, 0.0 }
 0x120   :  { %131 = vadd.xlane.f32.xlu0 %v130_v25 }
 0x18b   :  { %v129_v33 = vpop.xlane.xlu0 %128 }
 0x18c   :  { %v140_v34 = vmul.f32 %v139_v32, %v129_v33 }
 0x18e   :  { %v142_v35 = vsub.f32 %v125_v20, %v140_v34 }
 0x190   :  { %v144_v36 = vmul.f32 %v142_v35, %v142_v35 }
 0x192   :  { %v146_v37 = vsel %vm50_vm0, %v144_v36, 0.0 }
 0x193   :  { %147 = vadd.xlane.f32.xlu1 %v146_v37  ;;  %v132_v38 = vpop.xlane.xlu0 %131 }
 0x194   :  { %v141_v39 = vmul.f32 %v139_v32, %v132_v38 }
 0x196   :  { %v143_v40 = vsub.f32 %v126_v24, %v141_v39 }
 0x198   :  { %v145_v41 = vmul.f32 %v143_v40, %v143_v40 }
 0x19a   :  { %v149_v42 = vsel %vm50_vm0, %v145_v41, 0.0 }
 0x19b   :  { %150 = vadd.xlane.f32.xlu1 %v149_v42 }
 0x206   :  { %v148_v43 = vpop.xlane.xlu1 %147 }
 0x207   :  { %v152_v44 = vmul.f32 %v148_v43, %v139_v32 }
 0x209   :  { %v154_v45 = vadd.f32 1e-05, %v152_v44 }
 0x20b   :  { %235 = vrsqrt.f32 %v154_v45  ;;  %vm162_vm4 = vweird.f32 %v154_v45 }
 0x20e   :  { %v151_v46 = vpop.xlane.xlu1 %150 }
 0x20f   :  { %v153_v47 = vmul.f32 %v151_v46, %v139_v32 }
 0x211   :  { %v236_v48 = vpop.eup %235  ;;  %v155_v49 = vadd.f32 1e-05, %v153_v47 }
 0x212   :  { %v157_v50 = vmul.f32 %v236_v48, %v154_v45  ;;  %vm163_vm3 = vweird.f32 %v236_v48 }
 0x213   :  { %237 = vrsqrt.f32 %v155_v49  ;;  %vm164_vm5 = vmor %vm162_vm4, %vm163_vm3  ;;  %vm172_vm7 = vweird.f32 %v155_v49 }
 0x214   :  { %v158_v51 = vmul.f32 %v236_v48, %v157_v50 }
 0x216   :  { %v159_v52 = vmul.f32 0.5, %v158_v51 }
 0x218   :  { %v160_v53 = vsub.f32 1.5, %v159_v52 }
 0x219   :  { %v238_v54 = vpop.eup %237 }
 0x21a   :  { %v161_v55 = vmul.f32 %v236_v48, %v160_v53  ;;  %v167_v56 = vmul.f32 %v238_v54, %v155_v49  ;;  %vm173_vm6 = vweird.f32 %v238_v54 }
 0x21b   :  { %vm174_vm8 = vmor %vm172_vm7, %vm173_vm6 }
 0x21c   :  { %v165_v58 = vsel %vm164_vm5, %v236_v48, %v161_v55  ;;  %v168_v59 = vmul.f32 %v238_v54, %v167_v56 }
 0x21d   :  { %v176_v61 = vmul.f32 %v165_v58, %v142_v35 }
 0x21e   :  { %v169_v62 = vmul.f32 0.5, %v168_v59 }
 0x21f   :  { %v182_v63 = vmul.f32 %v231_v57, %v176_v61 }
 0x220   :  { %v170_v0 = vsub.f32 1.5, %v169_v62 }
 0x221   :  { %v188_v1 = vadd.f32 %v232_v60, %v182_v63 }
 0x222   :  { %v171_v2 = vmul.f32 %v238_v54, %v170_v0 }
 0x223   :  { %190 = vst.msk [vmem:[%s336_s7] sm:$0xff] %vm50_vm0, %v188_v1 }
 0x224   :  { %v175_v3 = vsel %vm174_vm8, %v238_v54, %v171_v2 }
 0x225   :  { %v177_v4 = vmul.f32 %v175_v3, %v143_v40 }
 0x227   :  { %v183_v5 = vmul.f32 %v231_v57, %v177_v4 }
 0x229   :  { %v189_v6 = vadd.f32 %v232_v60, %v183_v5 }
 0x22b   :  { %191 = vst.msk [vmem:[%s336_s7 + $0x8] sm:$0xff] %vm50_vm0, %v189_v6 }

// kernel: transformer_decoder_forward.11
= control target key start
LH: loop header
LB: loop body
LE: loop exit
PB: predicated region body
PF: predicated region fallthrough
CT: control target
= control target key end

     0   :  { %16 = vsyncpa [#allocation3], 0  ;;  %s1336_s0 = inlined_call_operand.vmem [shape: f32[2,8,32], index: 0, kind: input, shape index: {}]   ;;  %s1337_s1 = inlined_call_operand.vmem [shape: f32[2,10,32], index: 1, kind: input, shape index: {}]   ;;  %s1338_s2 = inlined_call_operand.vmem [shape: f32[8,10], index: 2, kind: input, shape index: {}]   ;;  %s1339_s3 = inlined_call_operand.vmem [shape: bf16[32,32], index: 3, kind: input, shape index: {}]   ;;  %s1340_s4 = inlined_call_operand.vmem [shape: bf16[32,64], index: 4, kind: input, shape index: {}]   ;;  %s1341_s5 = inlined_call_operand.vmem [shape: bf16[32,32], index: 5, kind: input, shape index: {}]   ;;  %s1342_s6 = inlined_call_operand.vmem [shape: f32[1,32], index: 6, kind: input, shape index: {}]   ;;  %s1343_s7 = inlined_call_operand.vmem [shape: f32[1,64], index: 7, kind: input, shape index: {}]   ;;  %s1344_s8 = inlined_call_operand.vmem [shape: f32[1,32], index: 8, kind: input, shape index: {}]   ;;  %s1345_s9 = inlined_call_operand.hbm [shape: f32[1,32], index: 9, kind: input, shape index: {}]   ;;  %s1346_s10 = inlined_call_operand.hbm [shape: f32[1,32], index: 10, kind: input, shape index: {}]   ;;  %s1347_s11 = inlined_call_operand.vmem [shape: f32[2,8,32], index: 11, kind: output, shape index: {}]  }
   0x1   :  { %17 = vsyncpa [#allocation5], 0  ;;  %s1208_s17 = smov 0  }
   0x2 LB: > { %s328_s20 = sshll.u32 %s1345_s9, 4  ;;  %s937_s21 = sadd.s32 4294967295, %s1133_s17   ;;  %s1133_s17 = sphi %s1208_s17, %s23_s17   ;;  %s329_s20 = int_to_ptr.hbm [resolvable:$true] %s328_s20 }
   0x3   : > { %p939_p0 = scmp.ge.s32.totalorder %s1133_s17, 1  ;;  %p295_p1 = scmp.lt.s32.totalorder %s1133_s17, 3 }
   0x4   : > { %p1009_p2 = scmp.eq.s32.totalorder %s937_s21, 0  ;;  %s1135_s23 = smov [#allocation2]  }
   0x5   : > { %p1219_p3 = pnand %p939_p0, %p295_p1  ;;  %s330_s24 = sshll.u32 %s1135_s23, 4  ;;  %s331_s24 = int_to_ptr.vmem [resolvable:$true] %s330_s24 }
   0x6   : > { %s340_s27 = sshll.u32 %s1346_s10, 4  ;;  %s1136_s28 = smov [#allocation4]   ;;  %s341_s27 = int_to_ptr.hbm [resolvable:$true] %s340_s27 }
   0x7   : > { %p1002_p4 = pneg %p1219_p3  ;;  %s342_s29 = sshll.u32 %s1136_s28, 4  ;;  %s343_s29 = int_to_ptr.vmem [resolvable:$true] %s342_s29 }
   0x8   : > { %370 = sbr.rel (%p1219_p3) target bundleno = 1627 (0x65b), region = 64 }
   0x9   : > { %p1003_p5 = pnand %p1009_p2, %p1002_p4 }
   0xb   : > { %1005 = dma.hbm_to_vmem [thread:$0]  (!%p1003_p5), %s329_s20, 16, %s331_s24, [#allocation3]  }
   0xc   : > { %1008 = dma.hbm_to_vmem [thread:$0]  (!%p1003_p5), %s341_s27, 16, %s343_s29, [#allocation5]  }
   0xd   : > { %1124 = dma.done.wait (%p1009_p2), [#allocation3], 16  }
   0xe   : > { %1126 = vsyncadd (%p1009_p2), [#allocation3], 4294967280 }
   0xf   : > { %1128 = dma.done.wait (%p1009_p2), [#allocation5], 16  }
  0x10   : > { %1130 = vsyncadd (%p1009_p2), [#allocation5], 4294967280  ;;  %p419_p6 = scmp.lt.s32.totalorder %s937_s21, 1  ;;  %v989_v0 = vld [vmem:[%s1339_s3 + $0x8] sm:$0xff]  ;;  %v988_v2 = vld [vmem:[%s1339_s3] sm:$0xff]  ;;  %vm457_vm0 = vcmask 261120  }
  0x11   : > { %v991_v1 = vld [vmem:[%s1340_s4 + $0x8] sm:$0xff]  ;;  %v990_v3 = vld [vmem:[%s1340_s4] sm:$0xff]  ;;  %467 = vmatpush.bf16.msra.mxu0 %v989_v0  ;;  %vm521_vm1 = vcmask 64512   ;;  %s1138_s16 = smov 96   ;;  %s1139_s18 = smov 112   ;;  %vm561_vm2 = vcmask 1044480  }
  0x12   : > { %s1350_s21 = smov (!%p419_p6, %s937_s21), 1  ;;  %504 = vmatpush.bf16.msra.mxu1 %v991_v1  ;;  %v1034_v9 = vld [vmem:[%s1342_s6] ss:$0 sm:$0xff]  ;;  %vm543_vm3 = vcmask 80896   ;;  %s1141_s23 = smov 88   ;;  %vm768_vm4 = vcmask 130048  }
  0x13   : > { %s946_s30 = sshll.u32 %s1350_s21, 3  ;;  %s987_s12 = sshll.u32 %s1350_s21, 4  ;;  %v1035_v13 = vld [vmem:[%s1343_s7] ss:$0 sm:$0xff]  ;;  %vm770_vm5 = vcmask 195584  }
  0x14   : > { %s422_s15 = scalar_lea.vmem %s1336_s0, %s946_s30  ;;  %s427_s19 = scalar_lea.vmem %s1337_s1, %s987_s12  ;;  %v512_v36 = vld [vmem:[%s1338_s2] sm:$0xff] }
  0x15   : > { %v1259_v4 = vld [vmem:[%s422_s15] sm:$0xff]  ;;  %v435_v6 = vld [vmem:[%s427_s19 + $0x8] sm:$0x3]  ;;  %468 = vmatpush.bf16.msra.mxu0 %v988_v2  ;;  %s1137_s15 = smov 120   ;;  %s1142_s24 = smov 80  }
  0x16   : > { %v434_v5 = vld [vmem:[%s427_s19] sm:$0xff]  ;;  %v436_v7 = vpack.c.bf16 %v1259_v4, %v1259_v4  ;;  %505 = vmatpush.bf16.msra.mxu1 %v990_v3  ;;  %s1140_s19 = smov 104   ;;  %s1143_s25 = smov 72  }
  0x17   : > { %v474_v8 = vpack.c.bf16 %v435_v6, %v434_v5  ;;  %s1144_s26 = smov 8   ;;  %s1145_s27 = smov 16  }
  0x18   : > { %958 = vmatmul.msk.bf16.vlgmr.msra.gmra.mxu0 %vm457_vm0, %v436_v7  ;;  %s1146_s28 = smov 24   ;;  %s431_s20 = scalar_lea.vmem %s1347_s11, %s946_s30 }
  0x19   : > { %967 = vmatmul.msk.bf16.vlgmr.msra.gmra.mxu1 %vm457_vm0, %v474_v8 }
  0x95   : > { %v470_v10 = vpop.f32.mrf.mxu0 }
  0x96   : > { %v507_v11 = vpop.f32.mrf.mxu1  ;;  %v471_v12 = vadd.f32 %v1034_v9, %v470_v10 }
  0x97   : > { %v508_v16 = vadd.f32 %v1035_v13, %v507_v11 }
  0x98   : > { %v513_v14 = vpack.c.bf16 %v471_v12, %v471_v12 }
  0x99   : > { %v514_v20 = vpack.c.bf16 %v508_v16, %v508_v16 }
  0x9a   : > { %v579_v15 = vunpack.c.l.b16 %v513_v14 }
  0x9b   : > { %v518_v23 = vunpack.c.l.b16 %v514_v20 }
  0x9c   : > { %v580_v17 = vpack.c.b16 %v579_v15, %v579_v15 }
  0x9d   : > { %v472_v19 = vpop.f32.mrf.mxu0 }
  0x9e   : > { %v509_v18 = vpop.f32.mrf.mxu1  ;;  %581 = vrot.lane.b32.xlu2 %v580_v17, %s1137_s15 }
  0x9f   : > { %v510_v21 = vadd.f32 %v1035_v13, %v509_v18 }
  0xa1   : > { %v515_v22 = vpack.c.bf16 %v510_v21, %v510_v21 }
  0xa3   : > { %v519_v24 = vunpack.c.l.b16 %v515_v22 }
  0xa5   : > { %v1271_v25 = vpack.c.b16 %v519_v24, %v518_v23 }
  0xa7   : > { %556 = vrot.lane.b32.xlu1 %v1271_v25, %s1138_s16  ;;  %641 = vrot.lane.b32.xlu2 %v1271_v25, %s1139_s18  ;;  %v526_v26 = vsel %vm521_vm1, %v1271_v25, 0 }
  0xa8   : > { %535 = vmatpush.bf16.xpose.msra.mxu2 %v526_v26 }
  0xaf   : > { %583 = vrot.lane.b32.xlu1 %v1271_v25, %s1137_s15  ;;  %968 = vmatmul.msk.bf16.vlgmr.msra.gmra.mxu2 %vm521_vm1, %v513_v14 }
  0xb0   : > { %697 = vrot.lane.b32.xlu2 %v580_v17, %s1140_s19 }
  0xb7   : > { %639 = vrot.lane.b32.xlu1 %v580_v17, %s1139_s18 }
  0xf8   : > { %v582_v27 = vpop.permute.xlu2 %581 }
 0x101   : > { %v642_v28 = vpop.permute.xlu2 %641 }
 0x102   : > { %v647_v29 = vsel %vm521_vm1, %v642_v28, 0 }
 0x103   : > { %656 = vmatpush.bf16.xpose.msrb.mxu1 %v647_v29 }
 0x10a   : > { %v698_v51 = vpop.permute.xlu2 %697 }
 0x119   : > { %v557_v30 = vpop.permute.xlu1 %556 }
 0x11a   : > { %v563_v31 = vsel %vm561_vm2, %v557_v30, 0 }
 0x11b   : > { %572 = vmatpush.bf16.msra.mxu3 %v563_v31 }
 0x121   : > { %v584_v32 = vpop.permute.xlu1 %583 }
 0x122   : > { %v589_v33 = vsel %vm521_vm1, %v584_v32, 0 }
 0x123   : > { %598 = vmatpush.bf16.xpose.msrb.mxu3 %v589_v33 }
 0x129   : > { %v640_v34 = vpop.permute.xlu1 %639 }
 0x12a   : > { %972 = vmatmul.msk.bf16.vlgmr.msrb.gmra.mxu1 %vm521_vm1, %v640_v34 }
 0x132   : > { %v537_v35 = vpop.f32.mrf.mxu2 }
 0x133   : > { %v541_v37 = vmul.f32 0.35355338, %v537_v35 }
 0x135   : > { %v542_v38 = vadd.f32 %v541_v37, %v512_v36 }
 0x137   : > { %v544_v39 = vsel %vm543_vm3, %v542_v38, -inf }
 0x138   : > { %545 = vmax.xlane.f32.xlu0 %v544_v39 }
 0x13a   : > { %v539_v40 = vpop.f32.mrf.mxu2 }
 0x1a7   : > { %v658_v41 = vpop.f32.mrf.mxu1 }
 0x1a8   : > { %v662_v42 = vmul.f32 0.35355338, %v658_v41 }
 0x1aa   : > { %v663_v43 = vadd.f32 %v662_v42, %v512_v36 }
 0x1ab   : > { %v546_v44 = vpop.xlane.xlu0 %545 }
 0x1ac   : > { %v547_v45 = vsub.f32 %v542_v38, %v546_v44  ;;  %v664_v46 = vsel %vm543_vm3, %v663_v43, -inf }
 0x1ad   : > { %665 = vmax.xlane.f32.xlu2 %v664_v46  ;;  %v993_v46 = vld [vmem:[%s1341_s5 + $0x8] sm:$0xff] }
 0x1ae   : > { %v548_v47 = vmul.f32 1.442695, %v547_v45  ;;  %802 = vmatpush.bf16.msra.mxu1 %v993_v46 }
 0x1af   : > { %v660_v48 = vpop.f32.mrf.mxu1 }
 0x1b0   : > { %1039 = vpow2.f32 %v548_v47  ;;  %v992_v47 = vld [vmem:[%s1341_s5] sm:$0xff] }
 0x1b2   : > { %803 = vmatpush.bf16.msra.mxu1 %v992_v47 }
 0x1b6   : > { %v1040_v49 = vpop.eup %1039 }
 0x1b7   : > { %v550_v50 = vsel %vm543_vm3, %v1040_v49, 0.0 }
 0x1b8   : > { %551 = vadd.xlane.f32.xlu0 %v550_v50 }
 0x1cc   : > { %699 = vrot.lane.b32.xlu0 %v1271_v25, %s1140_s19 }
 0x220   : > { %v666_v52 = vpop.xlane.xlu2 %665 }
 0x221   : > { %v667_v53 = vsub.f32 %v663_v43, %v666_v52 }
 0x223   : > { %v668_v54 = vmul.f32 1.442695, %v667_v53 }
 0x225   : > { %1041 = vpow2.f32 %v668_v54 }
 0x22b   : > { %v1042_v55 = vpop.eup %1041  ;;  %v552_v56 = vpop.xlane.xlu0 %551 }
 0x22c   : > { %1043 = vrcp.f32 %v552_v56  ;;  %v670_v57 = vsel %vm543_vm3, %v1042_v55, 0.0 }
 0x22d   : > { %671 = vadd.xlane.f32.xlu2 %v670_v57 }
 0x232   : > { %v1044_v58 = vpop.eup %1043 }
 0x233   : > { %v554_v59 = vmul.f32 %v1044_v58, %v1040_v49 }
 0x235   : > { %v555_v60 = vpack.c.bf16 %v554_v59, %v554_v59 }
 0x237   : > { %969 = vmatmul.msk.bf16.vlgmr.msra.gmra.mxu3 %vm543_vm3, %v555_v60 }
 0x23e   : > { %v700_v61 = vpop.permute.xlu0 %699 }
 0x23f   : > { %v705_v62 = vsel %vm521_vm1, %v700_v61, 0  ;;  %v1147_v61 = vmov 32.0  }
 0x240   : > { %714 = vmatpush.bf16.xpose.msra.mxu3 %v705_v62 }
 0x247   : > { %970 = vmatmul.msk.bf16.vlgmr.msrb.gmra.mxu3 %vm521_vm1, %v582_v27 }
 0x257   : > { %974 = vmatmul.msk.bf16.vlgmr.msra.gmra.mxu3 %vm521_vm1, %v698_v51 }
 0x2a0   : > { %v672_v24 = vpop.xlane.xlu2 %671 }
 0x2ba   : > { %v1297_v63 = vpop.f32.mrf.mxu3 }
 0x2c2   : > { %v576_v0 = vpop.f32.mrf.mxu3 }
 0x2ca   : > { %v600_v1 = vpop.f32.mrf.mxu3 }
 0x2cb   : > { %v604_v2 = vmul.f32 0.35355338, %v600_v1 }
 0x2cd   : > { %v605_v3 = vadd.f32 %v604_v2, %v512_v36 }
 0x2cf   : > { %v606_v5 = vsel %vm543_vm3, %v605_v3, -inf }
 0x2d0   : > { %607 = vmax.xlane.f32.xlu1 %v606_v5 }
 0x2d2   : > { %v602_v6 = vpop.f32.mrf.mxu3 }
 0x2da   : > { %v716_v7 = vpop.f32.mrf.mxu3 }
 0x2db   : > { %v720_v8 = vmul.f32 0.35355338, %v716_v7 }
 0x2dd   : > { %v721_v9 = vadd.f32 %v720_v8, %v512_v36 }
 0x2df   : > { %v722_v10 = vsel %vm543_vm3, %v721_v9, -inf }
 0x2e0   : > { %723 = vmax.xlane.f32.xlu0 %v722_v10 }
 0x2e2   : > { %v718_v11 = vpop.f32.mrf.mxu3 }
 0x2e9   : > { %618 = vrot.lane.b32.xlu1 %v1271_v25, %s1141_s23 }
 0x343   : > { %v608_v12 = vpop.xlane.xlu1 %607 }
 0x344   : > { %v609_v13 = vsub.f32 %v605_v3, %v608_v12 }
 0x346   : > { %v610_v14 = vmul.f32 1.442695, %v609_v13 }
 0x348   : > { %1045 = vpow2.f32 %v610_v14 }
 0x34e   : > { %v1046_v15 = vpop.eup %1045 }
 0x34f   : > { %v612_v16 = vsel %vm543_vm3, %v1046_v15, 0.0 }
 0x350   : > { %613 = vadd.xlane.f32.xlu2 %v612_v16 }
 0x353   : > { %v724_v17 = vpop.xlane.xlu0 %723 }
 0x354   : > { %v725_v18 = vsub.f32 %v721_v9, %v724_v17 }
 0x356   : > { %v726_v19 = vmul.f32 1.442695, %v725_v18  ;;  %v1037_v18 = vld [vmem:[#allocation2] ss:$0 sm:$0xff] }
 0x358   : > { %1047 = vpow2.f32 %v726_v19 }
 0x359   : > { %1049 = vrcp.f32 %v672_v24 }
 0x35b   : > { %v619_v20 = vpop.permute.xlu1 %618 }
 0x35c   : > { %v624_v21 = vsel %vm561_vm2, %v619_v20, 0  ;;  %v1038_v20 = vld [vmem:[#allocation4] ss:$0 sm:$0xff] }
 0x35d   : > { %633 = vmatpush.bf16.msrb.mxu0 %v624_v21 }
 0x35e   : > { %v1048_v22 = vpop.eup %1047 }
 0x35f   : > { %v728_v23 = vsel %vm543_vm3, %v1048_v22, 0.0  ;;  %v1050_v27 = vpop.eup %1049 }
 0x360   : > { %729 = vadd.xlane.f32.xlu0 %v728_v23  ;;  %v674_v29 = vmul.f32 %v1050_v27, %v1042_v55  ;;  %v1036_v55 = vld [vmem:[%s1344_s8] ss:$0 sm:$0xff] }
 0x362   : > { %v675_v34 = vpack.c.bf16 %v674_v29, %v674_v29 }
 0x368   : > { %676 = vrot.lane.b32.xlu2 %v1271_v25, %s1142_s24 }
 0x374   : > { %734 = vrot.lane.b32.xlu0 %v1271_v25, %s1143_s25 }
 0x3c3   : > { %v614_v26 = vpop.xlane.xlu2 %613 }
 0x3c4   : > { %1051 = vrcp.f32 %v614_v26 }
 0x3ca   : > { %v1052_v28 = vpop.eup %1051 }
 0x3cb   : > { %v616_v30 = vmul.f32 %v1052_v28, %v1046_v15  ;;  %v677_v31 = vpop.permute.xlu2 %676 }
 0x3cc   : > { %v682_v32 = vsel %vm561_vm2, %v677_v31, 0 }
 0x3cd   : > { %691 = vmatpush.bf16.msrb.mxu2 %v682_v32  ;;  %v617_v33 = vpack.c.bf16 %v616_v30, %v616_v30 }
 0x3cf   : > { %971 = vmatmul.msk.bf16.vlgmr.msrb.gmra.mxu0 %vm543_vm3, %v617_v33 }
 0x3d0   : > { %973 = vmatmul.msk.bf16.vlgmr.msrb.gmra.mxu2 %vm543_vm3, %v675_v34 }
 0x3d3   : > { %v730_v35 = vpop.xlane.xlu0 %729 }
 0x3d4   : > { %1053 = vrcp.f32 %v730_v35 }
 0x3d5   : > { %1055 = vrcp.f32 %v1147_v61 }
 0x3da   : > { %v1054_v25 = vpop.eup %1053 }
 0x3db   : > { %v732_v36 = vmul.f32 %v1054_v25, %v1048_v22  ;;  %v1056_v62 = vpop.eup %1055 }
 0x3dc   : > { %vm818_vm6 = vweird.f32 %v1056_v62 }
 0x3dd   : > { %v733_v39 = vpack.c.bf16 %v732_v36, %v732_v36 }
 0x3e6   : > { %v735_v37 = vpop.permute.xlu0 %734 }
 0x3e7   : > { %v740_v38 = vsel %vm561_vm2, %v735_v37, 0 }
 0x3e8   : > { %749 = vmatpush.bf16.msra.mxu0 %v740_v38 }
 0x3eb   : > { %975 = vmatmul.msk.bf16.vlgmr.msra.gmra.mxu0 %vm543_vm3, %v733_v39 }
 0x44c   : > { %v635_v40 = vpop.f32.mrf.mxu0 }
 0x44d   : > { %756 = vrot.lane.b32.xlu1 %v635_v40, %s1144_s26 }
 0x453   : > { %v693_v41 = vpop.f32.mrf.mxu2 }
 0x454   : > { %v637_v42 = vpop.f32.mrf.mxu0 }
 0x455   : > { %760 = vrot.lane.b32.xlu1 %v693_v41, %s1145_s27 }
 0x45b   : > { %v695_v43 = vpop.f32.mrf.mxu2 }
 0x468   : > { %v751_v44 = vpop.f32.mrf.mxu0 }
 0x469   : > { %764 = vrot.lane.b32.xlu2 %v751_v44, %s1146_s28 }
 0x470   : > { %v753_v45 = vpop.f32.mrf.mxu0 }
 0x4bf   : > { %v757_v48 = vpop.permute.xlu1 %756 }
 0x4c0   : > { %v767_v49 = vsel %vm521_vm1, %v1297_v63, %v757_v48  ;;  %v814_v63 = vmul.f32 32.0, %v1056_v62 }
 0x4c2   : > { %v815_v0 = vsub.f32 1.0, %v814_v63 }
 0x4c3   : > { %v765_v51 = vpop.permute.xlu2 %764 }
 0x4c4   : > { %v816_v1 = vmul.f32 %v1056_v62, %v815_v0 }
 0x4c6   : > { %v817_v2 = vadd.f32 %v1056_v62, %v816_v1 }
 0x4c7   : > { %v761_v50 = vpop.permute.xlu1 %760 }
 0x4c8   : > { %v769_v52 = vsel %vm768_vm4, %v767_v49, %v761_v50  ;;  %v819_v3 = vsel %vm818_vm6, %v1056_v62, %v817_v2 }
 0x4c9   : > { %v771_v53 = vsel %vm770_vm5, %v769_v52, %v765_v51 }
 0x4ca   : > { %v772_v54 = vpack.c.bf16 %v771_v53, %v771_v53 }
 0x4cc   : > { %984 = vmatmul.msk.bf16.vlgmr.msra.gmra.mxu1 %vm457_vm0, %v772_v54 }
 0x549   : > { %v805_v56 = vpop.f32.mrf.mxu1 }
 0x54a   : > { %v806_v57 = vadd.f32 %v1036_v55, %v805_v56 }
 0x54c   : > { %v809_v58 = vadd.f32 %v806_v57, %v1259_v4 }
 0x54e   : > { %v810_v59 = vsel %vm457_vm0, %v809_v58, 0.0 }
 0x54f   : > { %811 = vadd.xlane.f32.xlu0 %v810_v59 }
 0x551   : > { %v807_v60 = vpop.f32.mrf.mxu1 }
 0x5c2   : > { %v812_v5 = vpop.xlane.xlu0 %811 }
 0x5c3   : > { %v820_v6 = vmul.f32 %v819_v3, %v812_v5 }
 0x5c5   : > { %v821_v7 = vsub.f32 %v809_v58, %v820_v6 }
 0x5c7   : > { %v822_v8 = vmul.f32 %v821_v7, %v821_v7 }
 0x5c9   : > { %v823_v9 = vsel %vm457_vm0, %v822_v8, 0.0 }
 0x5ca   : > { %824 = vadd.xlane.f32.xlu1 %v823_v9 }
 0x63d   : > { %v825_v4 = vpop.xlane.xlu1 %824 }
 0x63e   : > { %v826_v10 = vmul.f32 %v825_v4, %v819_v3 }
 0x640   : > { %v827_v11 = vadd.f32 1e-05, %v826_v10 }
 0x642   : > { %1057 = vrsqrt.f32 %v827_v11  ;;  %vm834_vm8 = vweird.f32 %v827_v11 }
 0x648   : > { %v1058_v12 = vpop.eup %1057 }
 0x649   : > { %v829_v13 = vmul.f32 %v1058_v12, %v827_v11  ;;  %vm835_vm7 = vweird.f32 %v1058_v12 }
 0x64a   : > { %vm836_vm9 = vmor %vm834_vm8, %vm835_vm7 }
 0x64b   : > { %v830_v14 = vmul.f32 %v1058_v12, %v829_v13 }
 0x64d   : > { %v831_v15 = vmul.f32 0.5, %v830_v14 }
 0x64f   : > { %v832_v16 = vsub.f32 1.5, %v831_v15 }
 0x651   : > { %v833_v17 = vmul.f32 %v1058_v12, %v832_v16 }
 0x653   : > { %v837_v19 = vsel %vm836_vm9, %v1058_v12, %v833_v17 }
 0x654   : > { %v838_v21 = vmul.f32 %v837_v19, %v821_v7 }
 0x656   : > { %v843_v22 = vmul.f32 %v1037_v18, %v838_v21 }
 0x658   : > { %v848_v23 = vadd.f32 %v1038_v20, %v843_v22 }
 0x65a   : > { %849 = vst.msk [vmem:[%s431_s20] sm:$0xff] %vm457_vm0, %v848_v23 }
 0x65b PF: > { %s23_s17 = sadd.s32 1, %s1133_s17  }
 0x65c   : > { %p20_p7 = scmp.ge.s32.totalorder %s23_s17, 4  }
 0x65e   :  { %22 = sbr.rel (!%p20_p7) target bundleno = 2 (0x2), region = 106 }
 0x663   :  { %869 = vsyncpa [#allocation3], 1 }
 0x664   :  { %871 = vsyncpa [#allocation3 + $0x1], 1 }
 0x665   :  { %872 = vsyncpa [#allocation5], 1 }

// kernel: transformer_decoder_forward.13
= control target key start
LH: loop header
LB: loop body
LE: loop exit
PB: predicated region body
PF: predicated region fallthrough
CT: control target
= control target key end

     0   :  { %vm20_vm0 = vcmask 408576   ;;  %v140_v1 = vmov 0.0   ;;  %s188_s0 = inlined_call_operand.vmem [shape: f32[16,32], index: 0, kind: input, shape index: {}]   ;;  %s189_s1 = inlined_call_operand.vmem [shape: bf16[32,50], index: 1, kind: input, shape index: {}]   ;;  %s190_s2 = inlined_call_operand.vmem [shape: f32[1,50], index: 2, kind: input, shape index: {}]   ;;  %s191_s3 = inlined_call_operand.hbm [shape: f32[16,50], index: 3, kind: output, shape index: {}]  }
   0x1   :  { %v108_v0 = vld [vmem:[%s189_s1 + $0x8] sm:$0xff]  ;;  %21 = vst.msk [vmem:[#allocation2] sm:$0xff] %vm20_vm0, %v140_v1 }
   0x2   :  { %8 = vsyncpa [#allocation4], 0  ;;  %54 = vmatpush.bf16.msra.mxu0 %v108_v0  ;;  %v107_v2 = vld [vmem:[%s189_s1] sm:$0xff]  ;;  %v26_v4 = vld [vmem:[%s188_s0 + $0x8] sm:$0xff]  ;;  %22 = vst.msk [vmem:[#allocation2 + $0x8] sm:$0xff] %vm20_vm0, %v140_v1  ;;  %vm44_vm1 = vcmask 261120  }
   0x3   :  { %v25_v3 = vld [vmem:[%s188_s0] sm:$0xff]  ;;  %s141_s0 = smov [#allocation3]   ;;  %s86_s24 = sshll.u32 %s191_s3, 4  ;;  %s87_s24 = int_to_ptr.hbm [resolvable:$true] %s86_s24 }
   0x4   :  { %v27_v5 = vpack.c.bf16 %v26_v4, %v25_v3  ;;  %v113_v10 = vld [vmem:[%s190_s2] ss:$0 sm:$0xff]  ;;  %s84_s21 = sshll.u32 %s141_s0, 4  ;;  %s142_s2 = smov 128   ;;  %s85_s21 = int_to_ptr.vmem [resolvable:$true] %s84_s21 }
   0x5   :  { %s143_s25 = smov 8  }
   0x6   :  { %55 = vmatpush.bf16.msra.mxu0 %v107_v2 }
   0x8   :  { %v23_v6 = vld [vmem:[#allocation2] sm:$0xff] }
   0x9   :  { %106 = vmatmul.msk.bf16.vlgmr.msra.gmra.mxu0 %vm44_vm1, %v27_v5  ;;  %v24_v9 = vld [vmem:[#allocation2 + $0x8] sm:$0xff] }
  0x86   :  { %v57_v7 = vpop.f32.mrf.mxu0 }
  0x87   :  { %v62_v8 = vadd.f32 %v57_v7, %v23_v6 }
  0x89   :  { %65 = vst.msk [vmem:[#allocation2] sm:$0xff] %vm20_vm0, %v62_v8 }
  0x8e   :  { %v59_v11 = vpop.f32.mrf.mxu0 }
  0x8f   :  { %v63_v12 = vadd.f32 %v59_v11, %v24_v9 }
  0x90   :  { %v70_v13 = vld [vmem:[#allocation2] sm:$0xff] }
  0x91   :  { %66 = vst.msk [vmem:[#allocation2 + $0x8] sm:$0xff] %vm20_vm0, %v63_v12  ;;  %v76_v14 = vadd.f32 %v113_v10, %v70_v13 }
  0x93   :  { %78 = vst.msk [vmem:[#allocation3] sm:$0xff] %vm20_vm0, %v76_v14 }
  0x98   :  { %v71_v15 = vld [vmem:[#allocation2 + $0x8] sm:$0xff] }
  0x99   :  { %v77_v16 = vadd.f32 %v113_v10, %v71_v15 }
  0x9b   :  { %79 = vst.msk [vmem:[#allocation3 + $0x8] sm:$0xff] %vm20_vm0, %v77_v16 }
  0x9c   :  { %92 = dma.vmem_to_hbm [thread:$0]  %s85_s21, 256, %s87_s24, [#allocation4], %s142_s2, %s142_s2, %s143_s25  }
  0x9d   :  { %138 = dma.done.wait [#allocation4], 256  }
  0x9e   :  { %139 = vsyncadd [#allocation4], 4294967040 }
  0x9f   :  { %97 = vsyncpa [#allocation4], 1 }

</bundles_post_ra>
